<compile_context>
chip_gen: v7x
topology: tpu7x:2x2x1
jax: 0.10.0
libtpu: 0.0.40
codegen_flags: <defaults>
</compile_context>

<pallas_src>
import jax
import jax.numpy as jnp
from jax.experimental import pallas as pl
from jax.experimental.pallas import tpu as pltpu


def _round_up(x, m):
    return ((x + m - 1) // m) * m


def gru_fc_kernel(gi_ref, whh_ref, bhhn_ref, wfc_ref, bfc_ref, out_ref, h_ref):
    """One time-chunk of the GRU recurrence (+ fused FC on the last chunk).

    gi_ref  : (Tc, BB, 3*Hp) bf16  per-token gate pre-activations
                                   (= emb @ W_ih^T + b_ih, b_hh[r,z] pre-added),
                                   gate g lives in lanes [g*Hp : g*Hp + H]
    whh_ref : (Hp, 3*Hp)     bf16  padded W_hh^T (gate order r, z, n)
    bhhn_ref: (1, Hp)        f32   b_hh for the n gate (stays inside the r-mul)
    wfc_ref : (Hp, Cp)       bf16  padded W_fc^T
    bfc_ref : (1, Cp)        f32   padded b_fc
    out_ref : (BB, Cp)       f32   padded logits for this batch block
    h_ref   : (BB, Hp)       f32   scratch: hidden state persisted across chunks
    """
    t_chunk = pl.program_id(1)
    n_chunks = pl.num_programs(1)
    Tc = gi_ref.shape[0]
    BB, Hp = h_ref.shape

    @pl.when(t_chunk == 0)
    def _():
        h_ref[...] = jnp.zeros_like(h_ref)

    whh = whh_ref[...]                                        # bf16 (Hp, 3Hp)
    # Hoist the bias broadcast out of the recurrence (no CSE inside the loop).
    bhh_n = jnp.broadcast_to(bhhn_ref[...], (BB, Hp))         # f32

    def step(t, h_prev):                                      # h_prev: f32 vregs
        gi = gi_ref[t].astype(jnp.float32)                    # (BB, 3Hp)
        gh = jnp.dot(h_prev.astype(whh.dtype), whh,
                     preferred_element_type=jnp.float32)      # (BB, 3Hp)
        r = jax.nn.sigmoid(gi[:, 0 * Hp:1 * Hp] + gh[:, 0 * Hp:1 * Hp])
        z = jax.nn.sigmoid(gi[:, 1 * Hp:2 * Hp] + gh[:, 1 * Hp:2 * Hp])
        n = jnp.tanh(gi[:, 2 * Hp:3 * Hp] + r * (gh[:, 2 * Hp:3 * Hp] + bhh_n))
        return n + z * (h_prev - n)                           # = (1-z)*n + z*h

    h = jax.lax.fori_loop(0, Tc, step, h_ref[...],
                          unroll=True if Tc <= 32 else 8)
    h_ref[...] = h

    @pl.when(t_chunk == n_chunks - 1)
    def _():
        out_ref[...] = (jnp.dot(h.astype(wfc_ref.dtype), wfc_ref[...],
                                preferred_element_type=jnp.float32)
                        + bfc_ref[...])


def init_params(key, vocab_size, embed_dim, hidden_dim, num_classes):
    ks = jax.random.split(key, 7)
    k = 1.0 / jnp.sqrt(hidden_dim)
    emb = jax.random.normal(ks[0], (vocab_size, embed_dim), jnp.float32)
    emb = emb.at[0].set(0.0)  # padding_idx=0 -> zero row
    return {
        "embedding": emb,
        "w_ih": jax.random.uniform(ks[1], (3 * hidden_dim, embed_dim), jnp.float32, -k, k),
        "w_hh": jax.random.uniform(ks[2], (3 * hidden_dim, hidden_dim), jnp.float32, -k, k),
        "b_ih": jax.random.uniform(ks[3], (3 * hidden_dim,), jnp.float32, -k, k),
        "b_hh": jax.random.uniform(ks[4], (3 * hidden_dim,), jnp.float32, -k, k),
        "w_fc": jax.random.uniform(ks[5], (num_classes, hidden_dim), jnp.float32, -k, k),
        "b_fc": jax.random.uniform(ks[6], (num_classes,), jnp.float32, -k, k),
    }


def password_rnn_forward(tokens, params, *, time_chunk=64):
    """tokens: (B, T) int32 token ids  ->  logits (B, num_classes) float32."""
    B, T = tokens.shape
    emb_table = params["embedding"]                  # (V, E)
    w_ih = params["w_ih"]                            # (3H, E)
    w_hh = params["w_hh"]                            # (3H, H)
    b_ih = params["b_ih"]                            # (3H,)
    b_hh = params["b_hh"]                            # (3H,)
    w_fc = params["w_fc"]                            # (C, H)
    b_fc = params["b_fc"]                            # (C,)
    V = emb_table.shape[0]
    H = w_hh.shape[1]
    C = w_fc.shape[0]

    # --- pad to vreg / MXU geometry --------------------------------------
    Hp = _round_up(H, 128)        # lane-aligned hidden size (aligned gate slices)
    Cp = _round_up(C, 128)        # lane-dense unmasked output stores
    SUB = 16                      # bf16 sublane packing granularity
    if B <= SUB:
        BB = SUB                  # single batch block
    elif B <= 512:
        BB = _round_up(-(-B // 2), SUB)   # >=2 blocks -> megacore on v7x
    else:
        BB = 128
    Bp = _round_up(B, BB)
    n_bblk = Bp // BB

    # --- time chunking (keeps VMEM bounded for long sequences) -----------
    Tc = min(T, time_chunk)
    Tp = _round_up(T, Tc)
    n_tchunk = Tp // Tc

    # --- hoist the input projection: vocab-sized gate lookup table (f32) --
    # gate_table[v] = emb[v] @ W_ih^T + b_ih ; pre-add b_hh for r,z gates.
    gate_table = emb_table @ w_ih.T + b_ih[None, :]                    # (V, 3H)
    gate_table = gate_table.at[:, :2 * H].add(b_hh[None, :2 * H])

    gate_table_p = jnp.zeros((V, 3 * Hp), jnp.float32)
    whh_t = w_hh.T                                                     # (H, 3H)
    whh_p = jnp.zeros((Hp, 3 * Hp), jnp.float32)
    for g in range(3):
        gate_table_p = gate_table_p.at[:, g * Hp:g * Hp + H].set(
            gate_table[:, g * H:(g + 1) * H])
        whh_p = whh_p.at[:H, g * Hp:g * Hp + H].set(whh_t[:, g * H:(g + 1) * H])

    bhh_n = jnp.zeros((1, Hp), jnp.float32).at[0, :H].set(b_hh[2 * H:3 * H])
    wfc_p = jnp.zeros((Hp, Cp), jnp.float32).at[:H, :C].set(w_fc.T)
    bfc_p = jnp.zeros((1, Cp), jnp.float32).at[0, :C].set(b_fc)

    # time-major gather of per-token gate pre-activations, padded batch (f32)
    gi = jnp.take(gate_table_p, tokens.T, axis=0)                      # (T, B, 3Hp)
    gi = jnp.pad(gi, ((0, 0), (0, Bp - B), (0, 0)))                    # (T, Bp, 3Hp)
    if Tp > T:
        # Identity GRU steps for the time padding: gi_z = +1e4 forces z = 1,
        # so h passes through unchanged.
        pad_steps = jnp.zeros((Tp - T, Bp, 3 * Hp), jnp.float32)
        pad_steps = pad_steps.at[:, :, Hp:2 * Hp].set(1e4)
        gi = jnp.concatenate([gi, pad_steps], axis=0)                  # (Tp, Bp, 3Hp)

    # bf16 for the big operands (gate table math was done in f32 above).
    gi_bf = gi.astype(jnp.bfloat16)
    whh_bf = whh_p.astype(jnp.bfloat16)
    wfc_bf = wfc_p.astype(jnp.bfloat16)

    # Resident (grid-invariant) weight/bias specs.  Their index_map is constant
    # so they are DMA'd once; footprint is tiny (double-buffering is moot).
    resident = lambda shape: pl.BlockSpec(shape, lambda b, t: tuple(0 for _ in shape))

    logits_p = pl.pallas_call(
        gru_fc_kernel,
        out_shape=jax.ShapeDtypeStruct((Bp, Cp), jnp.float32),
        grid_spec=pltpu.PrefetchScalarGridSpec(
            num_scalar_prefetch=0,
            grid=(n_bblk, n_tchunk),                      # (parallel, arbitrary)
            in_specs=[
                pl.BlockSpec((Tc, BB, 3 * Hp), lambda b, t: (t, b, 0)),  # gate slab chunk
                resident((Hp, 3 * Hp)),                                  # W_hh^T (bf16)
                resident((1, Hp)),                                       # b_hh (n gate)
                resident((Hp, Cp)),                                      # W_fc^T (bf16)
                resident((1, Cp)),                                       # b_fc
            ],
            out_specs=pl.BlockSpec((BB, Cp), lambda b, t: (b, 0)),
            scratch_shapes=[pltpu.VMEM((BB, Hp), jnp.float32)],          # persistent h
        ),
        compiler_params=pltpu.CompilerParams(
            dimension_semantics=("parallel", "arbitrary"),
            vmem_limit_bytes=32 * 1024 * 1024,
        ),
    )(gi_bf, whh_bf, bhh_n, wfc_bf, bfc_p)

    return logits_p[:B, :C]


def password_rnn_reference(tokens, params):
    """Pure-JAX f32 reference matching PyTorch GRU semantics (gate order r,z,n)."""
    emb = jnp.take(params["embedding"], tokens, axis=0)  # (B, T, E)
    B = emb.shape[0]
    H = params["w_hh"].shape[1]
    h = jnp.zeros((B, H), jnp.float32)

    def step(h, x_t):
        gi = x_t @ params["w_ih"].T + params["b_ih"]
        gh = h @ params["w_hh"].T + params["b_hh"]
        r = jax.nn.sigmoid(gi[:, :H] + gh[:, :H])
        z = jax.nn.sigmoid(gi[:, H:2 * H] + gh[:, H:2 * H])
        n = jnp.tanh(gi[:, 2 * H:] + r * gh[:, 2 * H:])
        h_new = (1.0 - z) * n + z * h
        return h_new, None

    h_n, _ = jax.lax.scan(step, h, jnp.transpose(emb, (1, 0, 2)))
    return h_n @ params["w_fc"].T + params["b_fc"]


if __name__ == "__main__":
    VOCAB, EMBED, HIDDEN, CLASSES = 64, 16, 32, 3
    B, T = 2, 8

    key = jax.random.PRNGKey(0)
    k_tok, k_par = jax.random.split(key)
    tokens = jax.random.randint(k_tok, (B, T), 0, VOCAB, dtype=jnp.int32)
    params = init_params(k_par, VOCAB, EMBED, HIDDEN, CLASSES)

    logits = jax.block_until_ready(password_rnn_forward(tokens, params))
    ref = jax.block_until_ready(password_rnn_reference(tokens, params))

    assert logits.shape == (B, CLASSES)
    # bf16 gate slab / weights vs f32 reference -> 2e-2 tolerance.
    assert jnp.allclose(logits, ref, rtol=2e-2, atol=2e-2), (
        f"max abs err = {jnp.max(jnp.abs(logits - ref))}")

    print("KERNEL_OK")
</pallas_src>

<mosaic_0001>
module attributes {stable_mosaic.version = 11 : i64} {
  func.func @gru_fc_kernel(%arg0: i32, %arg1: i32, %arg2: memref<8x16x384xbf16, #tpu.memory_space<vmem>>, %arg3: memref<128x384xbf16, #tpu.memory_space<vmem>>, %arg4: memref<1x128xf32, #tpu.memory_space<vmem>>, %arg5: memref<128x128xbf16, #tpu.memory_space<vmem>>, %arg6: memref<1x128xf32, #tpu.memory_space<vmem>>, %arg7: memref<16x128xf32, #tpu.memory_space<vmem>>, %arg8: memref<16x128xf32, #tpu.memory_space<vmem>>) attributes {dimension_semantics = [#tpu.dimension_semantics<parallel>, #tpu.dimension_semantics<arbitrary>], iteration_bounds = array<i64: 1, 1>, scalar_prefetch = 0 : i64, scratch_operands = 1 : i64, tpu.core_type = #tpu.core_type<tc>, window_params = [{transform_indices = @transform_0, window_bounds = array<i64: 8, 16, 384>}, {pipeline_mode = #tpu.pipeline_mode<synchronous>, transform_indices = @transform_1, window_bounds = array<i64: 128, 384>}, {pipeline_mode = #tpu.pipeline_mode<synchronous>, transform_indices = @transform_2, window_bounds = array<i64: 1, 128>}, {pipeline_mode = #tpu.pipeline_mode<synchronous>, transform_indices = @transform_3, window_bounds = array<i64: 128, 128>}, {pipeline_mode = #tpu.pipeline_mode<synchronous>, transform_indices = @transform_4, window_bounds = array<i64: 1, 128>}, {transform_indices = @transform_5, window_bounds = array<i64: 16, 128>}]} {
    %c0_i32 = arith.constant 0 : i32
    %0 = arith.cmpi eq, %arg1, %c0_i32 : i32
    %1 = arith.extui %0 : i1 to i32
    %c0_i32_0 = arith.constant 0 : i32
    %2 = arith.cmpi ne, %1, %c0_i32_0 : i32
    scf.if %2 {
      %cst_50 = arith.constant 0.000000e+00 : f32
      %260 = vector.broadcast %cst_50 : f32 to vector<16x128xf32>
      %c0_51 = arith.constant 0 : index
      %c0_52 = arith.constant 0 : index
      %261 = vector.load %arg8[%c0_51, %c0_52] : memref<16x128xf32, #tpu.memory_space<vmem>>, vector<16x128xf32>
      tpu.vector_store %arg8[%c0_51, %c0_52], %260 {strides = array<i32>} : memref<16x128xf32, #tpu.memory_space<vmem>>, vector<16x128xf32>,
    } else {
    }
    %c0 = arith.constant 0 : index
    %c0_1 = arith.constant 0 : index
    %3 = vector.load %arg3[%c0, %c0_1] : memref<128x384xbf16, #tpu.memory_space<vmem>>, vector<128x384xbf16>
    %c0_2 = arith.constant 0 : index
    %c0_3 = arith.constant 0 : index
    %4 = vector.load %arg4[%c0_2, %c0_3] : memref<1x128xf32, #tpu.memory_space<vmem>>, vector<1x128xf32>
    %5 = vector.shape_cast %4 : vector<1x128xf32> to vector<1x128xf32>
    %6 = vector.broadcast %5 : vector<1x128xf32> to vector<16x128xf32>
    %c0_4 = arith.constant 0 : index
    %c0_5 = arith.constant 0 : index
    %7 = vector.load %arg8[%c0_4, %c0_5] : memref<16x128xf32, #tpu.memory_space<vmem>>, vector<16x128xf32>
    %c0_i32_6 = arith.constant 0 : i32
    %8 = arith.index_cast %c0_i32_6 : i32 to index
    %c0_7 = arith.constant 0 : index
    %c0_8 = arith.constant 0 : index
    %9 = vector.load %arg2[%8, %c0_7, %c0_8] : memref<8x16x384xbf16, #tpu.memory_space<vmem>>, vector<1x16x384xbf16>
    %10 = vector.shape_cast %9 : vector<1x16x384xbf16> to vector<16x384xbf16>
    %11 = arith.extf %10 : vector<16x384xbf16> to vector<16x384xf32>
    %12 = arith.truncf %7 : vector<16x128xf32> to vector<16x128xbf16>
    %cst = arith.constant dense<0.000000e+00> : vector<16x384xf32>
    %13 = tpu.matmul %12, %3, %cst {dimension_numbers = #tpu.dot_dimension_numbers<[1], [0], [0], [1], [0, 0, 1, 1], [], []>} : vector<16x128xbf16>, vector<128x384xbf16>, vector<16x384xf32> -> vector<16x384xf32>
    %14 = vector.extract_strided_slice %11 {offsets = [0, 0], sizes = [16, 128], strides = [1, 1]} : vector<16x384xf32> to vector<16x128xf32>
    %15 = vector.extract_strided_slice %13 {offsets = [0, 0], sizes = [16, 128], strides = [1, 1]} : vector<16x384xf32> to vector<16x128xf32>
    %16 = arith.addf %14, %15 : vector<16x128xf32>
    %17 = arith.negf %16 : vector<16x128xf32>
    %18 = math.exp %17 : vector<16x128xf32>
    %cst_9 = arith.constant 1.000000e+00 : f32
    %19 = vector.broadcast %cst_9 : f32 to vector<16x128xf32>
    %20 = arith.addf %19, %18 : vector<16x128xf32>
    %21 = arith.divf %19, %20 : vector<16x128xf32>
    %22 = vector.extract_strided_slice %11 {offsets = [0, 128], sizes = [16, 128], strides = [1, 1]} : vector<16x384xf32> to vector<16x128xf32>
    %23 = vector.extract_strided_slice %13 {offsets = [0, 128], sizes = [16, 128], strides = [1, 1]} : vector<16x384xf32> to vector<16x128xf32>
    %24 = arith.addf %22, %23 : vector<16x128xf32>
    %25 = arith.negf %24 : vector<16x128xf32>
    %26 = math.exp %25 : vector<16x128xf32>
    %cst_10 = arith.constant 1.000000e+00 : f32
    %27 = vector.broadcast %cst_10 : f32 to vector<16x128xf32>
    %28 = arith.addf %27, %26 : vector<16x128xf32>
    %29 = arith.divf %27, %28 : vector<16x128xf32>
    %30 = vector.extract_strided_slice %11 {offsets = [0, 256], sizes = [16, 128], strides = [1, 1]} : vector<16x384xf32> to vector<16x128xf32>
    %31 = vector.extract_strided_slice %13 {offsets = [0, 256], sizes = [16, 128], strides = [1, 1]} : vector<16x384xf32> to vector<16x128xf32>
    %32 = arith.addf %31, %6 : vector<16x128xf32>
    %33 = arith.mulf %21, %32 : vector<16x128xf32>
    %34 = arith.addf %30, %33 : vector<16x128xf32>
    %35 = math.tanh %34 : vector<16x128xf32>
    %36 = arith.subf %7, %35 : vector<16x128xf32>
    %37 = arith.mulf %29, %36 : vector<16x128xf32>
    %38 = arith.addf %35, %37 : vector<16x128xf32>
    %c1_i32 = arith.constant 1 : i32
    %39 = arith.index_cast %c1_i32 : i32 to index
    %c0_11 = arith.constant 0 : index
    %c0_12 = arith.constant 0 : index
    %40 = vector.load %arg2[%39, %c0_11, %c0_12] : memref<8x16x384xbf16, #tpu.memory_space<vmem>>, vector<1x16x384xbf16>
    %41 = vector.shape_cast %40 : vector<1x16x384xbf16> to vector<16x384xbf16>
    %42 = arith.extf %41 : vector<16x384xbf16> to vector<16x384xf32>
    %43 = arith.truncf %38 : vector<16x128xf32> to vector<16x128xbf16>
    %cst_13 = arith.constant dense<0.000000e+00> : vector<16x384xf32>
    %44 = tpu.matmul %43, %3, %cst_13 {dimension_numbers = #tpu.dot_dimension_numbers<[1], [0], [0], [1], [0, 0, 1, 1], [], []>} : vector<16x128xbf16>, vector<128x384xbf16>, vector<16x384xf32> -> vector<16x384xf32>
    %45 = vector.extract_strided_slice %42 {offsets = [0, 0], sizes = [16, 128], strides = [1, 1]} : vector<16x384xf32> to vector<16x128xf32>
    %46 = vector.extract_strided_slice %44 {offsets = [0, 0], sizes = [16, 128], strides = [1, 1]} : vector<16x384xf32> to vector<16x128xf32>
    %47 = arith.addf %45, %46 : vector<16x128xf32>
    %48 = arith.negf %47 : vector<16x128xf32>
    %49 = math.exp %48 : vector<16x128xf32>
    %cst_14 = arith.constant 1.000000e+00 : f32
    %50 = vector.broadcast %cst_14 : f32 to vector<16x128xf32>
    %51 = arith.addf %50, %49 : vector<16x128xf32>
    %52 = arith.divf %50, %51 : vector<16x128xf32>
    %53 = vector.extract_strided_slice %42 {offsets = [0, 128], sizes = [16, 128], strides = [1, 1]} : vector<16x384xf32> to vector<16x128xf32>
    %54 = vector.extract_strided_slice %44 {offsets = [0, 128], sizes = [16, 128], strides = [1, 1]} : vector<16x384xf32> to vector<16x128xf32>
    %55 = arith.addf %53, %54 : vector<16x128xf32>
    %56 = arith.negf %55 : vector<16x128xf32>
    %57 = math.exp %56 : vector<16x128xf32>
    %cst_15 = arith.constant 1.000000e+00 : f32
    %58 = vector.broadcast %cst_15 : f32 to vector<16x128xf32>
    %59 = arith.addf %58, %57 : vector<16x128xf32>
    %60 = arith.divf %58, %59 : vector<16x128xf32>
    %61 = vector.extract_strided_slice %42 {offsets = [0, 256], sizes = [16, 128], strides = [1, 1]} : vector<16x384xf32> to vector<16x128xf32>
    %62 = vector.extract_strided_slice %44 {offsets = [0, 256], sizes = [16, 128], strides = [1, 1]} : vector<16x384xf32> to vector<16x128xf32>
    %63 = arith.addf %62, %6 : vector<16x128xf32>
    %64 = arith.mulf %52, %63 : vector<16x128xf32>
    %65 = arith.addf %61, %64 : vector<16x128xf32>
    %66 = math.tanh %65 : vector<16x128xf32>
    %67 = arith.subf %38, %66 : vector<16x128xf32>
    %68 = arith.mulf %60, %67 : vector<16x128xf32>
    %69 = arith.addf %66, %68 : vector<16x128xf32>
    %c2_i32 = arith.constant 2 : i32
    %70 = arith.index_cast %c2_i32 : i32 to index
    %c0_16 = arith.constant 0 : index
    %c0_17 = arith.constant 0 : index
    %71 = vector.load %arg2[%70, %c0_16, %c0_17] : memref<8x16x384xbf16, #tpu.memory_space<vmem>>, vector<1x16x384xbf16>
    %72 = vector.shape_cast %71 : vector<1x16x384xbf16> to vector<16x384xbf16>
    %73 = arith.extf %72 : vector<16x384xbf16> to vector<16x384xf32>
    %74 = arith.truncf %69 : vector<16x128xf32> to vector<16x128xbf16>
    %cst_18 = arith.constant dense<0.000000e+00> : vector<16x384xf32>
    %75 = tpu.matmul %74, %3, %cst_18 {dimension_numbers = #tpu.dot_dimension_numbers<[1], [0], [0], [1], [0, 0, 1, 1], [], []>} : vector<16x128xbf16>, vector<128x384xbf16>, vector<16x384xf32> -> vector<16x384xf32>
    %76 = vector.extract_strided_slice %73 {offsets = [0, 0], sizes = [16, 128], strides = [1, 1]} : vector<16x384xf32> to vector<16x128xf32>
    %77 = vector.extract_strided_slice %75 {offsets = [0, 0], sizes = [16, 128], strides = [1, 1]} : vector<16x384xf32> to vector<16x128xf32>
    %78 = arith.addf %76, %77 : vector<16x128xf32>
    %79 = arith.negf %78 : vector<16x128xf32>
    %80 = math.exp %79 : vector<16x128xf32>
    %cst_19 = arith.constant 1.000000e+00 : f32
    %81 = vector.broadcast %cst_19 : f32 to vector<16x128xf32>
    %82 = arith.addf %81, %80 : vector<16x128xf32>
    %83 = arith.divf %81, %82 : vector<16x128xf32>
    %84 = vector.extract_strided_slice %73 {offsets = [0, 128], sizes = [16, 128], strides = [1, 1]} : vector<16x384xf32> to vector<16x128xf32>
    %85 = vector.extract_strided_slice %75 {offsets = [0, 128], sizes = [16, 128], strides = [1, 1]} : vector<16x384xf32> to vector<16x128xf32>
    %86 = arith.addf %84, %85 : vector<16x128xf32>
    %87 = arith.negf %86 : vector<16x128xf32>
    %88 = math.exp %87 : vector<16x128xf32>
    %cst_20 = arith.constant 1.000000e+00 : f32
    %89 = vector.broadcast %cst_20 : f32 to vector<16x128xf32>
    %90 = arith.addf %89, %88 : vector<16x128xf32>
    %91 = arith.divf %89, %90 : vector<16x128xf32>
    %92 = vector.extract_strided_slice %73 {offsets = [0, 256], sizes = [16, 128], strides = [1, 1]} : vector<16x384xf32> to vector<16x128xf32>
    %93 = vector.extract_strided_slice %75 {offsets = [0, 256], sizes = [16, 128], strides = [1, 1]} : vector<16x384xf32> to vector<16x128xf32>
    %94 = arith.addf %93, %6 : vector<16x128xf32>
    %95 = arith.mulf %83, %94 : vector<16x128xf32>
    %96 = arith.addf %92, %95 : vector<16x128xf32>
    %97 = math.tanh %96 : vector<16x128xf32>
    %98 = arith.subf %69, %97 : vector<16x128xf32>
    %99 = arith.mulf %91, %98 : vector<16x128xf32>
    %100 = arith.addf %97, %99 : vector<16x128xf32>
    %c3_i32 = arith.constant 3 : i32
    %101 = arith.index_cast %c3_i32 : i32 to index
    %c0_21 = arith.constant 0 : index
    %c0_22 = arith.constant 0 : index
    %102 = vector.load %arg2[%101, %c0_21, %c0_22] : memref<8x16x384xbf16, #tpu.memory_space<vmem>>, vector<1x16x384xbf16>
    %103 = vector.shape_cast %102 : vector<1x16x384xbf16> to vector<16x384xbf16>
    %104 = arith.extf %103 : vector<16x384xbf16> to vector<16x384xf32>
    %105 = arith.truncf %100 : vector<16x128xf32> to vector<16x128xbf16>
    %cst_23 = arith.constant dense<0.000000e+00> : vector<16x384xf32>
    %106 = tpu.matmul %105, %3, %cst_23 {dimension_numbers = #tpu.dot_dimension_numbers<[1], [0], [0], [1], [0, 0, 1, 1], [], []>} : vector<16x128xbf16>, vector<128x384xbf16>, vector<16x384xf32> -> vector<16x384xf32>
    %107 = vector.extract_strided_slice %104 {offsets = [0, 0], sizes = [16, 128], strides = [1, 1]} : vector<16x384xf32> to vector<16x128xf32>
    %108 = vector.extract_strided_slice %106 {offsets = [0, 0], sizes = [16, 128], strides = [1, 1]} : vector<16x384xf32> to vector<16x128xf32>
    %109 = arith.addf %107, %108 : vector<16x128xf32>
    %110 = arith.negf %109 : vector<16x128xf32>
    %111 = math.exp %110 : vector<16x128xf32>
    %cst_24 = arith.constant 1.000000e+00 : f32
    %112 = vector.broadcast %cst_24 : f32 to vector<16x128xf32>
    %113 = arith.addf %112, %111 : vector<16x128xf32>
    %114 = arith.divf %112, %113 : vector<16x128xf32>
    %115 = vector.extract_strided_slice %104 {offsets = [0, 128], sizes = [16, 128], strides = [1, 1]} : vector<16x384xf32> to vector<16x128xf32>
    %116 = vector.extract_strided_slice %106 {offsets = [0, 128], sizes = [16, 128], strides = [1, 1]} : vector<16x384xf32> to vector<16x128xf32>
    %117 = arith.addf %115, %116 : vector<16x128xf32>
    %118 = arith.negf %117 : vector<16x128xf32>
    %119 = math.exp %118 : vector<16x128xf32>
    %cst_25 = arith.constant 1.000000e+00 : f32
    %120 = vector.broadcast %cst_25 : f32 to vector<16x128xf32>
    %121 = arith.addf %120, %119 : vector<16x128xf32>
    %122 = arith.divf %120, %121 : vector<16x128xf32>
    %123 = vector.extract_strided_slice %104 {offsets = [0, 256], sizes = [16, 128], strides = [1, 1]} : vector<16x384xf32> to vector<16x128xf32>
    %124 = vector.extract_strided_slice %106 {offsets = [0, 256], sizes = [16, 128], strides = [1, 1]} : vector<16x384xf32> to vector<16x128xf32>
    %125 = arith.addf %124, %6 : vector<16x128xf32>
    %126 = arith.mulf %114, %125 : vector<16x128xf32>
    %127 = arith.addf %123, %126 : vector<16x128xf32>
    %128 = math.tanh %127 : vector<16x128xf32>
    %129 = arith.subf %100, %128 : vector<16x128xf32>
    %130 = arith.mulf %122, %129 : vector<16x128xf32>
    %131 = arith.addf %128, %130 : vector<16x128xf32>
    %c4_i32 = arith.constant 4 : i32
    %132 = arith.index_cast %c4_i32 : i32 to index
    %c0_26 = arith.constant 0 : index
    %c0_27 = arith.constant 0 : index
    %133 = vector.load %arg2[%132, %c0_26, %c0_27] : memref<8x16x384xbf16, #tpu.memory_space<vmem>>, vector<1x16x384xbf16>
    %134 = vector.shape_cast %133 : vector<1x16x384xbf16> to vector<16x384xbf16>
    %135 = arith.extf %134 : vector<16x384xbf16> to vector<16x384xf32>
    %136 = arith.truncf %131 : vector<16x128xf32> to vector<16x128xbf16>
    %cst_28 = arith.constant dense<0.000000e+00> : vector<16x384xf32>
    %137 = tpu.matmul %136, %3, %cst_28 {dimension_numbers = #tpu.dot_dimension_numbers<[1], [0], [0], [1], [0, 0, 1, 1], [], []>} : vector<16x128xbf16>, vector<128x384xbf16>, vector<16x384xf32> -> vector<16x384xf32>
    %138 = vector.extract_strided_slice %135 {offsets = [0, 0], sizes = [16, 128], strides = [1, 1]} : vector<16x384xf32> to vector<16x128xf32>
    %139 = vector.extract_strided_slice %137 {offsets = [0, 0], sizes = [16, 128], strides = [1, 1]} : vector<16x384xf32> to vector<16x128xf32>
    %140 = arith.addf %138, %139 : vector<16x128xf32>
    %141 = arith.negf %140 : vector<16x128xf32>
    %142 = math.exp %141 : vector<16x128xf32>
    %cst_29 = arith.constant 1.000000e+00 : f32
    %143 = vector.broadcast %cst_29 : f32 to vector<16x128xf32>
    %144 = arith.addf %143, %142 : vector<16x128xf32>
    %145 = arith.divf %143, %144 : vector<16x128xf32>
    %146 = vector.extract_strided_slice %135 {offsets = [0, 128], sizes = [16, 128], strides = [1, 1]} : vector<16x384xf32> to vector<16x128xf32>
    %147 = vector.extract_strided_slice %137 {offsets = [0, 128], sizes = [16, 128], strides = [1, 1]} : vector<16x384xf32> to vector<16x128xf32>
    %148 = arith.addf %146, %147 : vector<16x128xf32>
    %149 = arith.negf %148 : vector<16x128xf32>
    %150 = math.exp %149 : vector<16x128xf32>
    %cst_30 = arith.constant 1.000000e+00 : f32
    %151 = vector.broadcast %cst_30 : f32 to vector<16x128xf32>
    %152 = arith.addf %151, %150 : vector<16x128xf32>
    %153 = arith.divf %151, %152 : vector<16x128xf32>
    %154 = vector.extract_strided_slice %135 {offsets = [0, 256], sizes = [16, 128], strides = [1, 1]} : vector<16x384xf32> to vector<16x128xf32>
    %155 = vector.extract_strided_slice %137 {offsets = [0, 256], sizes = [16, 128], strides = [1, 1]} : vector<16x384xf32> to vector<16x128xf32>
    %156 = arith.addf %155, %6 : vector<16x128xf32>
    %157 = arith.mulf %145, %156 : vector<16x128xf32>
    %158 = arith.addf %154, %157 : vector<16x128xf32>
    %159 = math.tanh %158 : vector<16x128xf32>
    %160 = arith.subf %131, %159 : vector<16x128xf32>
    %161 = arith.mulf %153, %160 : vector<16x128xf32>
    %162 = arith.addf %159, %161 : vector<16x128xf32>
    %c5_i32 = arith.constant 5 : i32
    %163 = arith.index_cast %c5_i32 : i32 to index
    %c0_31 = arith.constant 0 : index
    %c0_32 = arith.constant 0 : index
    %164 = vector.load %arg2[%163, %c0_31, %c0_32] : memref<8x16x384xbf16, #tpu.memory_space<vmem>>, vector<1x16x384xbf16>
    %165 = vector.shape_cast %164 : vector<1x16x384xbf16> to vector<16x384xbf16>
    %166 = arith.extf %165 : vector<16x384xbf16> to vector<16x384xf32>
    %167 = arith.truncf %162 : vector<16x128xf32> to vector<16x128xbf16>
    %cst_33 = arith.constant dense<0.000000e+00> : vector<16x384xf32>
    %168 = tpu.matmul %167, %3, %cst_33 {dimension_numbers = #tpu.dot_dimension_numbers<[1], [0], [0], [1], [0, 0, 1, 1], [], []>} : vector<16x128xbf16>, vector<128x384xbf16>, vector<16x384xf32> -> vector<16x384xf32>
    %169 = vector.extract_strided_slice %166 {offsets = [0, 0], sizes = [16, 128], strides = [1, 1]} : vector<16x384xf32> to vector<16x128xf32>
    %170 = vector.extract_strided_slice %168 {offsets = [0, 0], sizes = [16, 128], strides = [1, 1]} : vector<16x384xf32> to vector<16x128xf32>
    %171 = arith.addf %169, %170 : vector<16x128xf32>
    %172 = arith.negf %171 : vector<16x128xf32>
    %173 = math.exp %172 : vector<16x128xf32>
    %cst_34 = arith.constant 1.000000e+00 : f32
    %174 = vector.broadcast %cst_34 : f32 to vector<16x128xf32>
    %175 = arith.addf %174, %173 : vector<16x128xf32>
    %176 = arith.divf %174, %175 : vector<16x128xf32>
    %177 = vector.extract_strided_slice %166 {offsets = [0, 128], sizes = [16, 128], strides = [1, 1]} : vector<16x384xf32> to vector<16x128xf32>
    %178 = vector.extract_strided_slice %168 {offsets = [0, 128], sizes = [16, 128], strides = [1, 1]} : vector<16x384xf32> to vector<16x128xf32>
    %179 = arith.addf %177, %178 : vector<16x128xf32>
    %180 = arith.negf %179 : vector<16x128xf32>
    %181 = math.exp %180 : vector<16x128xf32>
    %cst_35 = arith.constant 1.000000e+00 : f32
    %182 = vector.broadcast %cst_35 : f32 to vector<16x128xf32>
    %183 = arith.addf %182, %181 : vector<16x128xf32>
    %184 = arith.divf %182, %183 : vector<16x128xf32>
    %185 = vector.extract_strided_slice %166 {offsets = [0, 256], sizes = [16, 128], strides = [1, 1]} : vector<16x384xf32> to vector<16x128xf32>
    %186 = vector.extract_strided_slice %168 {offsets = [0, 256], sizes = [16, 128], strides = [1, 1]} : vector<16x384xf32> to vector<16x128xf32>
    %187 = arith.addf %186, %6 : vector<16x128xf32>
    %188 = arith.mulf %176, %187 : vector<16x128xf32>
    %189 = arith.addf %185, %188 : vector<16x128xf32>
    %190 = math.tanh %189 : vector<16x128xf32>
    %191 = arith.subf %162, %190 : vector<16x128xf32>
    %192 = arith.mulf %184, %191 : vector<16x128xf32>
    %193 = arith.addf %190, %192 : vector<16x128xf32>
    %c6_i32 = arith.constant 6 : i32
    %194 = arith.index_cast %c6_i32 : i32 to index
    %c0_36 = arith.constant 0 : index
    %c0_37 = arith.constant 0 : index
    %195 = vector.load %arg2[%194, %c0_36, %c0_37] : memref<8x16x384xbf16, #tpu.memory_space<vmem>>, vector<1x16x384xbf16>
    %196 = vector.shape_cast %195 : vector<1x16x384xbf16> to vector<16x384xbf16>
    %197 = arith.extf %196 : vector<16x384xbf16> to vector<16x384xf32>
    %198 = arith.truncf %193 : vector<16x128xf32> to vector<16x128xbf16>
    %cst_38 = arith.constant dense<0.000000e+00> : vector<16x384xf32>
    %199 = tpu.matmul %198, %3, %cst_38 {dimension_numbers = #tpu.dot_dimension_numbers<[1], [0], [0], [1], [0, 0, 1, 1], [], []>} : vector<16x128xbf16>, vector<128x384xbf16>, vector<16x384xf32> -> vector<16x384xf32>
    %200 = vector.extract_strided_slice %197 {offsets = [0, 0], sizes = [16, 128], strides = [1, 1]} : vector<16x384xf32> to vector<16x128xf32>
    %201 = vector.extract_strided_slice %199 {offsets = [0, 0], sizes = [16, 128], strides = [1, 1]} : vector<16x384xf32> to vector<16x128xf32>
    %202 = arith.addf %200, %201 : vector<16x128xf32>
    %203 = arith.negf %202 : vector<16x128xf32>
    %204 = math.exp %203 : vector<16x128xf32>
    %cst_39 = arith.constant 1.000000e+00 : f32
    %205 = vector.broadcast %cst_39 : f32 to vector<16x128xf32>
    %206 = arith.addf %205, %204 : vector<16x128xf32>
    %207 = arith.divf %205, %206 : vector<16x128xf32>
    %208 = vector.extract_strided_slice %197 {offsets = [0, 128], sizes = [16, 128], strides = [1, 1]} : vector<16x384xf32> to vector<16x128xf32>
    %209 = vector.extract_strided_slice %199 {offsets = [0, 128], sizes = [16, 128], strides = [1, 1]} : vector<16x384xf32> to vector<16x128xf32>
    %210 = arith.addf %208, %209 : vector<16x128xf32>
    %211 = arith.negf %210 : vector<16x128xf32>
    %212 = math.exp %211 : vector<16x128xf32>
    %cst_40 = arith.constant 1.000000e+00 : f32
    %213 = vector.broadcast %cst_40 : f32 to vector<16x128xf32>
    %214 = arith.addf %213, %212 : vector<16x128xf32>
    %215 = arith.divf %213, %214 : vector<16x128xf32>
    %216 = vector.extract_strided_slice %197 {offsets = [0, 256], sizes = [16, 128], strides = [1, 1]} : vector<16x384xf32> to vector<16x128xf32>
    %217 = vector.extract_strided_slice %199 {offsets = [0, 256], sizes = [16, 128], strides = [1, 1]} : vector<16x384xf32> to vector<16x128xf32>
    %218 = arith.addf %217, %6 : vector<16x128xf32>
    %219 = arith.mulf %207, %218 : vector<16x128xf32>
    %220 = arith.addf %216, %219 : vector<16x128xf32>
    %221 = math.tanh %220 : vector<16x128xf32>
    %222 = arith.subf %193, %221 : vector<16x128xf32>
    %223 = arith.mulf %215, %222 : vector<16x128xf32>
    %224 = arith.addf %221, %223 : vector<16x128xf32>
    %c7_i32 = arith.constant 7 : i32
    %225 = arith.index_cast %c7_i32 : i32 to index
    %c0_41 = arith.constant 0 : index
    %c0_42 = arith.constant 0 : index
    %226 = vector.load %arg2[%225, %c0_41, %c0_42] : memref<8x16x384xbf16, #tpu.memory_space<vmem>>, vector<1x16x384xbf16>
    %227 = vector.shape_cast %226 : vector<1x16x384xbf16> to vector<16x384xbf16>
    %228 = arith.extf %227 : vector<16x384xbf16> to vector<16x384xf32>
    %229 = arith.truncf %224 : vector<16x128xf32> to vector<16x128xbf16>
    %cst_43 = arith.constant dense<0.000000e+00> : vector<16x384xf32>
    %230 = tpu.matmul %229, %3, %cst_43 {dimension_numbers = #tpu.dot_dimension_numbers<[1], [0], [0], [1], [0, 0, 1, 1], [], []>} : vector<16x128xbf16>, vector<128x384xbf16>, vector<16x384xf32> -> vector<16x384xf32>
    %231 = vector.extract_strided_slice %228 {offsets = [0, 0], sizes = [16, 128], strides = [1, 1]} : vector<16x384xf32> to vector<16x128xf32>
    %232 = vector.extract_strided_slice %230 {offsets = [0, 0], sizes = [16, 128], strides = [1, 1]} : vector<16x384xf32> to vector<16x128xf32>
    %233 = arith.addf %231, %232 : vector<16x128xf32>
    %234 = arith.negf %233 : vector<16x128xf32>
    %235 = math.exp %234 : vector<16x128xf32>
    %cst_44 = arith.constant 1.000000e+00 : f32
    %236 = vector.broadcast %cst_44 : f32 to vector<16x128xf32>
    %237 = arith.addf %236, %235 : vector<16x128xf32>
    %238 = arith.divf %236, %237 : vector<16x128xf32>
    %239 = vector.extract_strided_slice %228 {offsets = [0, 128], sizes = [16, 128], strides = [1, 1]} : vector<16x384xf32> to vector<16x128xf32>
    %240 = vector.extract_strided_slice %230 {offsets = [0, 128], sizes = [16, 128], strides = [1, 1]} : vector<16x384xf32> to vector<16x128xf32>
    %241 = arith.addf %239, %240 : vector<16x128xf32>
    %242 = arith.negf %241 : vector<16x128xf32>
    %243 = math.exp %242 : vector<16x128xf32>
    %cst_45 = arith.constant 1.000000e+00 : f32
    %244 = vector.broadcast %cst_45 : f32 to vector<16x128xf32>
    %245 = arith.addf %244, %243 : vector<16x128xf32>
    %246 = arith.divf %244, %245 : vector<16x128xf32>
    %247 = vector.extract_strided_slice %228 {offsets = [0, 256], sizes = [16, 128], strides = [1, 1]} : vector<16x384xf32> to vector<16x128xf32>
    %248 = vector.extract_strided_slice %230 {offsets = [0, 256], sizes = [16, 128], strides = [1, 1]} : vector<16x384xf32> to vector<16x128xf32>
    %249 = arith.addf %248, %6 : vector<16x128xf32>
    %250 = arith.mulf %238, %249 : vector<16x128xf32>
    %251 = arith.addf %247, %250 : vector<16x128xf32>
    %252 = math.tanh %251 : vector<16x128xf32>
    %253 = arith.subf %224, %252 : vector<16x128xf32>
    %254 = arith.mulf %246, %253 : vector<16x128xf32>
    %255 = arith.addf %252, %254 : vector<16x128xf32>
    %c8_i32 = arith.constant 8 : i32
    %c0_46 = arith.constant 0 : index
    %c0_47 = arith.constant 0 : index
    %256 = vector.load %arg8[%c0_46, %c0_47] : memref<16x128xf32, #tpu.memory_space<vmem>>, vector<16x128xf32>
    tpu.vector_store %arg8[%c0_46, %c0_47], %255 {strides = array<i32>} : memref<16x128xf32, #tpu.memory_space<vmem>>, vector<16x128xf32>,
    %c0_i32_48 = arith.constant 0 : i32
    %257 = arith.cmpi eq, %arg1, %c0_i32_48 : i32
    %258 = arith.extui %257 : i1 to i32
    %c0_i32_49 = arith.constant 0 : i32
    %259 = arith.cmpi ne, %258, %c0_i32_49 : i32
    scf.if %259 {
      %260 = arith.truncf %255 : vector<16x128xf32> to vector<16x128xbf16>
      %c0_50 = arith.constant 0 : index
      %c0_51 = arith.constant 0 : index
      %261 = vector.load %arg5[%c0_50, %c0_51] : memref<128x128xbf16, #tpu.memory_space<vmem>>, vector<128x128xbf16>
      %cst_52 = arith.constant dense<0.000000e+00> : vector<16x128xf32>
      %262 = tpu.matmul %260, %261, %cst_52 {dimension_numbers = #tpu.dot_dimension_numbers<[1], [0], [0], [1], [0, 0, 1, 1], [], []>} : vector<16x128xbf16>, vector<128x128xbf16>, vector<16x128xf32> -> vector<16x128xf32>
      %c0_53 = arith.constant 0 : index
      %c0_54 = arith.constant 0 : index
      %263 = vector.load %arg6[%c0_53, %c0_54] : memref<1x128xf32, #tpu.memory_space<vmem>>, vector<1x128xf32>
      %264 = vector.broadcast %263 : vector<1x128xf32> to vector<16x128xf32>
      %265 = arith.addf %262, %264 : vector<16x128xf32>
      %c0_55 = arith.constant 0 : index
      %c0_56 = arith.constant 0 : index
      %266 = vector.load %arg7[%c0_55, %c0_56] : memref<16x128xf32, #tpu.memory_space<vmem>>, vector<16x128xf32>
      tpu.vector_store %arg7[%c0_55, %c0_56], %265 {strides = array<i32>} : memref<16x128xf32, #tpu.memory_space<vmem>>, vector<16x128xf32>,
    } else {
    }
    return
  }
  func.func @transform_0(%arg0: i32, %arg1: i32) -> (i32, i32, i32) {
    %c0_i32 = arith.constant 0 : i32
    %c0_i32_0 = arith.constant 0 : i32
    return %arg1, %arg0, %c0_i32 : i32, i32, i32
  }
  func.func @transform_1(%arg0: i32, %arg1: i32) -> (i32, i32) {
    %c0_i32 = arith.constant 0 : i32
    %c0_i32_0 = arith.constant 0 : i32
    %c0_i32_1 = arith.constant 0 : i32
    return %c0_i32, %c0_i32_0 : i32, i32
  }
  func.func @transform_2(%arg0: i32, %arg1: i32) -> (i32, i32) {
    %c0_i32 = arith.constant 0 : i32
    %c0_i32_0 = arith.constant 0 : i32
    %c0_i32_1 = arith.constant 0 : i32
    return %c0_i32, %c0_i32_0 : i32, i32
  }
  func.func @transform_3(%arg0: i32, %arg1: i32) -> (i32, i32) {
    %c0_i32 = arith.constant 0 : i32
    %c0_i32_0 = arith.constant 0 : i32
    %c0_i32_1 = arith.constant 0 : i32
    return %c0_i32, %c0_i32_0 : i32, i32
  }
  func.func @transform_4(%arg0: i32, %arg1: i32) -> (i32, i32) {
    %c0_i32 = arith.constant 0 : i32
    %c0_i32_0 = arith.constant 0 : i32
    %c0_i32_1 = arith.constant 0 : i32
    return %c0_i32, %c0_i32_0 : i32, i32
  }
  func.func @transform_5(%arg0: i32, %arg1: i32) -> (i32, i32) {
    %c0_i32 = arith.constant 0 : i32
    %c0_i32_0 = arith.constant 0 : i32
    return %arg0, %c0_i32 : i32, i32
  }
}

</mosaic_0001>

<bundles_post_ra>
// kernel: tpu_custom_call.1
= control target key start
LH: loop header
LB: loop body
LE: loop exit
PB: predicated region body
PF: predicated region fallthrough
CT: control target
= control target key end

     0   :  { %10 = vsyncpa [#allocation4], 0  ;;  %s2709_s0 = inlined_call_operand.hbm [shape: bf16[8,16,384], index: 0, kind: input, shape index: {}]   ;;  %s2710_s1 = inlined_call_operand.hbm [shape: bf16[128,384], index: 1, kind: input, shape index: {}]   ;;  %s2711_s2 = inlined_call_operand.vmem [shape: f32[1,128], index: 2, kind: input, shape index: {}]   ;;  %s2712_s3 = inlined_call_operand.hbm [shape: bf16[128,128], index: 3, kind: input, shape index: {}]   ;;  %s2713_s4 = inlined_call_operand.vmem [shape: f32[1,128], index: 4, kind: input, shape index: {}]   ;;  %s2714_s5 = inlined_call_operand.hbm [shape: f32[16,128], index: 5, kind: output, shape index: {}]  }
   0x1   :  { %11 = vsyncpa [#allocation7], 0 }
   0x2   :  { %12 = vsyncpa [#allocation5], 0  ;;  %s2139_s18 = smov [#allocation6]   ;;  %s2140_s20 = smov [#allocation3]  }
   0x3   :  { %s30_s19 = sshll.u32 %s2139_s18, 4  ;;  %s18_s21 = sshll.u32 %s2140_s20, 4  ;;  %s31_s19 = int_to_ptr.vmem [resolvable:$true] %s30_s19  ;;  %s2183_s21 = int_to_ptr.vmem [resolvable:$true] %s18_s21 }
   0x4   :  { %s2045_s24 = scalar_lea.hbm %s2710_s1, 3072 }
   0x5   :  { %p2046_p0 = scmp.ne.s32.totalorder %s2710_s1, %s2045_s24  ;;  %p2049_p1 = scmp.lt.u32.totalorder %s2045_s24, %s2710_s1 }
   0x7   :  { %p2051_p2 = pnand %p2049_p1, %p2046_p0 }
   0x9   :  { %2054 = shalt.err (!%p2051_p2)
}
   0xa   :  { %s2055_s29 = scalar_lea.vmem %s31_s19, 3072  ;;  %p2060_p4 = scmp.lt.s32.totalorder %s31_s19, %s31_s19 }
   0xb   :  { %p2056_p3 = scmp.ne.s32.totalorder %s31_s19, %s2055_s29  ;;  %p2061_p5 = scmp.lt.s32.totalorder %s2055_s29, %s2055_s29 }
   0xd   :  { %p2062_p6 = por %p2061_p5, %p2060_p4 }
   0xf   :  { %p2063_p7 = pnand %p2062_p6, %p2056_p3 }
  0x11   :  { %2066 = shalt.err (!%p2063_p7)
}
  0x12   :  { %s2141_s30 = smov 192   ;;  %s2142_s6 = smov 12  }
  0x13   :  { %36 = dma.hbm_to_vmem [thread:$0]  %s2710_s1, 3072, %s31_s19, [#allocation7], %s2141_s30, %s2141_s30, %s2142_s6  }
  0x14   :  { %s2067_s11 = scalar_lea.hbm %s2709_s0, 3072 }
  0x15   :  { %p2068_p8 = scmp.ne.s32.totalorder %s2709_s0, %s2067_s11  ;;  %p2071_p9 = scmp.lt.u32.totalorder %s2067_s11, %s2709_s0 }
  0x17   :  { %p2073_p10 = pnand %p2071_p9, %p2068_p8 }
  0x19   :  { %2076 = shalt.err (!%p2073_p10)
}
  0x1a   :  { %s2077_s16 = scalar_lea.vmem %s2183_s21, 3072  ;;  %p2082_p12 = scmp.lt.s32.totalorder %s2183_s21, %s2183_s21 }
  0x1b   :  { %p2078_p11 = scmp.ne.s32.totalorder %s2183_s21, %s2077_s16  ;;  %p2083_p13 = scmp.lt.s32.totalorder %s2077_s16, %s2077_s16 }
  0x1d   :  { %p2084_p0 = por %p2083_p13, %p2082_p12 }
  0x1f   :  { %p2085_p1 = pnand %p2084_p0, %p2078_p11 }
  0x21   :  { %2088 = shalt.err (!%p2085_p1)
}
  0x22   :  { %24 = dma.hbm_to_vmem [thread:$0]  %s2709_s0, 3072, %s2183_s21, [#allocation4], %s2141_s30, %s2141_s30, %s2142_s6  }
  0x23   :  { %s2143_s18 = smov [#allocation8]   ;;  %s2089_s23 = scalar_lea.hbm %s2712_s3, 1024 }
  0x24   :  { %s44_s19 = sshll.u32 %s2143_s18, 4  ;;  %p2090_p2 = scmp.ne.s32.totalorder %s2712_s3, %s2089_s23  ;;  %s45_s19 = int_to_ptr.vmem [resolvable:$true] %s44_s19 }
  0x25   :  { %p2093_p3 = scmp.lt.u32.totalorder %s2089_s23, %s2712_s3 }
  0x27   :  { %p2095_p4 = pnand %p2093_p3, %p2090_p2 }
  0x29   :  { %2098 = shalt.err (!%p2095_p4)
}
  0x2a   :  { %s2099_s28 = scalar_lea.vmem %s45_s19, 1024  ;;  %p2104_p6 = scmp.lt.s32.totalorder %s45_s19, %s45_s19 }
  0x2b   :  { %p2100_p5 = scmp.ne.s32.totalorder %s45_s19, %s2099_s28  ;;  %p2105_p7 = scmp.lt.s32.totalorder %s2099_s28, %s2099_s28 }
  0x2d   :  { %p2106_p8 = por %p2105_p7, %p2104_p6 }
  0x2f   :  { %p2107_p9 = pnand %p2106_p8, %p2100_p5 }
  0x31   :  { %2110 = shalt.err (!%p2107_p9)
}
  0x32   :  { %s2144_s0 = smov 64   ;;  %s2145_s21 = smov 4  }
  0x33   :  { %50 = dma.hbm_to_vmem [thread:$0]  %s2712_s3, 1024, %s45_s19, [#allocation7], %s2144_s0, %s2144_s0, %s2145_s21  }
  0x34   :  { %2133 = dma.done.wait [#allocation4], 3072  }
  0x35   :  { %2134 = vsyncadd [#allocation4], 4294964224 }
  0x36   :  { %2135 = dma.done.wait [#allocation7], 4096  }
  0x37   :  { %2136 = vsyncadd [#allocation7], 4294963200  ;;  %v2146_v0 = vmov 0.0   ;;  %v2147_v1 = vmov 0   ;;  %vm2148_vm0 = vmmov 0   ;;  %v2149_v25 = vmov 0.0|0.0  }
  0x38   :  { %1626 = vmatprep.subr.bf16.mxu1 %v2146_v0  ;;  %281 = vmatprep.mubr.bf16.mxu0 %v2147_v1  ;;  %v2230_v2 = vld [vmem:[#allocation6 + $0x4] ss:$12 sps:$4 sm:$0xff]   ;;  %v2232_v3 = vld [vmem:[#allocation6] ss:$12 sps:$4 sm:$0xff]   ;;  %v2235_v4 = vld [vmem:[#allocation6 + $0x1c] ss:$12 sps:$4 sm:$0xff]  }
  0x39   :  { %1642 = vmatprep.mubr.msk.bf16.mxu1 %vm2148_vm0, %v2146_v0  ;;  %249 = vmatprep.subr.bf16.mxu0 %v2230_v2  ;;  %v2238_v5 = vld [vmem:[#allocation6 + $0x18] ss:$12 sps:$4 sm:$0xff]   ;;  %v2241_v6 = vld [vmem:[#allocation6 + $0x34] ss:$12 sps:$4 sm:$0xff]   ;;  %v2244_v7 = vld [vmem:[#allocation6 + $0x30] ss:$12 sps:$4 sm:$0xff]  }
  0x3a   :  { %250 = vmatpush1.bf16.msra.mxu0 %v2232_v3  ;;  %v2247_v8 = vld [vmem:[#allocation6 + $0x4c] ss:$12 sps:$4 sm:$0xff]   ;;  %v2249_v9 = vld [vmem:[#allocation6 + $0x8] ss:$12 sps:$4 sm:$0xff]   ;;  %v2256_v11 = vld [vmem:[#allocation6 + $0x64] ss:$12 sps:$4 sm:$0xff]  }
  0x3b   :  { %251 = vmatprep.subr.bf16.mxu0 %v2235_v4  ;;  %v2252_v10 = vld [vmem:[#allocation6 + $0x48] ss:$12 sps:$4 sm:$0xff]   ;;  %1627 = vmatpush3.bf16.msra.mxu1 %v2249_v9  ;;  %v2259_v12 = vld [vmem:[#allocation6 + $0x20] ss:$12 sps:$4 sm:$0xff]   ;;  %v2265_v14 = vld [vmem:[#allocation6 + $0x38] ss:$12 sps:$4 sm:$0xff]  }
  0x3c   :  { %1628 = vmatprep.subr.bf16.mxu1 %v2146_v0  ;;  %v2261_v13 = vld [vmem:[#allocation6 + $0x60] ss:$12 sps:$4 sm:$0xff]   ;;  %v2268_v15 = vld [vmem:[#allocation6 + $0x7c] ss:$12 sps:$4 sm:$0xff]   ;;  %v2271_v16 = vld [vmem:[#allocation6 + $0x78] ss:$12 sps:$4 sm:$0xff]  }
  0x3d   :  { %v2273_v17 = vld [vmem:[#allocation6 + $0x94] ss:$12 sps:$4 sm:$0xff]   ;;  %v2275_v18 = vld [vmem:[#allocation6 + $0x50] ss:$12 sps:$4 sm:$0xff]   ;;  %v2288_v21 = vld [vmem:[#allocation6 + $0xac] ss:$12 sps:$4 sm:$0xff]  }
  0x3e   :  { %252 = vmatpush1.bf16.msra.mxu0 %v2238_v5  ;;  %v2281_v19 = vld [vmem:[#allocation6 + $0x90] ss:$12 sps:$4 sm:$0xff]   ;;  %v2283_v20 = vld [vmem:[#allocation6 + $0x68] ss:$12 sps:$4 sm:$0xff]   ;;  %v2295_v23 = vld [vmem:[#allocation6 + $0x80] ss:$12 sps:$4 sm:$0xff]  }
  0x3f   :  { %253 = vmatprep.subr.bf16.mxu0 %v2241_v6  ;;  %1629 = vmatpush3.bf16.msra.mxu1 %v2259_v12  ;;  %v2292_v22 = vld [vmem:[#allocation6 + $0xa8] ss:$12 sps:$4 sm:$0xff]   ;;  %v2301_v24 = vld [vmem:[#allocation6 + $0x98] ss:$12 sps:$4 sm:$0xff]   ;;  %v2306_v26 = vld [vmem:[#allocation6 + $0xb0] ss:$12 sps:$4 sm:$0xff]  }
  0x40   :  { %1630 = vmatprep.subr.bf16.mxu1 %v2146_v0  ;;  %v110_v27 = vld [vmem:[#allocation3] sm:$0xff]  ;;  %v112_v28 = vld [vmem:[#allocation3 + $0xc] sm:$0xff]  ;;  %v111_v54 = vld [vmem:[#allocation3 + $0x8] ss:$12 sps:$4 sm:$0xff]   ;;  %s2150_s10 = smov [#allocation9]  }
  0x41   :  { %v114_v29 = vunpack.c.l.bf16 %v110_v27  ;;  %v117_v30 = vunpack.c.l.bf16 %v112_v28  ;;  %v115_v38 = vunpack.c.h.bf16 %v110_v27  ;;  %v118_v40 = vunpack.c.h.bf16 %v112_v28  ;;  %v2349_v53 = vld [vmem:[%s2711_s2] ss:$0 sm:$0xff]  ;;  %s1466_s11 = sshll.u32 %s2150_s10, 4  ;;  %s1467_s11 = int_to_ptr.vmem [resolvable:$true] %s1466_s11 }
  0x42   :  { %254 = vmatpush1.bf16.msra.mxu0 %v2244_v7  ;;  %v116_v57 = vunpack.c.l.bf16 %v111_v54  ;;  %v119_v61 = vunpack.c.h.bf16 %v111_v54  ;;  %s2111_s12 = scalar_lea.vmem %s1467_s11, 256  ;;  %p2116_p11 = scmp.lt.s32.totalorder %s1467_s11, %s1467_s11 }
  0x43   :  { %255 = vmatprep.subr.bf16.mxu0 %v2247_v8  ;;  %1631 = vmatpush3.bf16.msra.mxu1 %v2265_v14  ;;  %p2112_p10 = scmp.ne.s32.totalorder %s1467_s11, %s2111_s12  ;;  %p2117_p12 = scmp.lt.s32.totalorder %s2111_s12, %s2111_s12 }
  0x44   :  { %1632 = vmatprep.subr.bf16.mxu1 %v2146_v0 }
  0x45   :  { %p2118_p13 = por %p2117_p12, %p2116_p11 }
  0x46   :  { %256 = vmatpush1.bf16.msra.mxu0 %v2252_v10 }
  0x47   :  { %257 = vmatprep.subr.bf16.mxu0 %v2256_v11  ;;  %1633 = vmatpush3.bf16.msra.mxu1 %v2275_v18  ;;  %p2119_p0 = pnand %p2118_p13, %p2112_p10 }
  0x48   :  { %1634 = vmatprep.subr.bf16.mxu1 %v2146_v0 }
  0x4a   :  { %258 = vmatpush1.bf16.msra.mxu0 %v2261_v13 }
  0x4b   :  { %259 = vmatprep.subr.bf16.mxu0 %v2268_v15  ;;  %1635 = vmatpush3.bf16.msra.mxu1 %v2283_v20 }
  0x4c   :  { %1636 = vmatprep.subr.bf16.mxu1 %v2146_v0 }
  0x4e   :  { %260 = vmatpush1.bf16.msra.mxu0 %v2271_v16 }
  0x4f   :  { %261 = vmatprep.subr.bf16.mxu0 %v2273_v17  ;;  %1637 = vmatpush3.bf16.msra.mxu1 %v2295_v23 }
  0x50   :  { %1638 = vmatprep.subr.bf16.mxu1 %v2146_v0 }
  0x52   :  { %262 = vmatpush1.bf16.msra.mxu0 %v2281_v19 }
  0x53   :  { %263 = vmatprep.subr.bf16.mxu0 %v2288_v21  ;;  %1639 = vmatpush3.bf16.msra.mxu1 %v2301_v24 }
  0x54   :  { %1640 = vmatprep.subr.bf16.mxu1 %v2146_v0 }
  0x56   :  { %264 = vmatpush1.bf16.msra.mxu0 %v2292_v22 }
  0x57   :  { %387 = vmatprep.subr.bf16.mxu0 %v2230_v2  ;;  %1641 = vmatpush3.bf16.msra.mxu1 %v2306_v26 }
  0x58   :  { %1646 = vmatprep.subr.bf16.mxu1 %v2146_v0 }
  0x59   :  { %282 = vmatmul.mubr.bf16.vlgmr.msra.gmra.mrb[0].mxu0 %v2149_v25 }
  0x5a   :  { %388 = vmatpush1.bf16.msra.mxu0 %v2232_v3  ;;  %419 = vmatprep.mubr.bf16.mxu0 %v2147_v1 }
  0x5b   :  { %389 = vmatprep.subr.bf16.mxu0 %v2235_v4  ;;  %1643 = vmatmul.mubr.bf16.vlgmr.msra.gmra.mrb[0].mxu1 %v2149_v25 }
  0x5c   :  { %1647 = vmatpush3.bf16.msra.mxu1 %v2249_v9  ;;  %1662 = vmatprep.mubr.msk.bf16.mxu1 %vm2148_vm0, %v2146_v0 }
  0x5d   :  { %1648 = vmatprep.subr.bf16.mxu1 %v2146_v0 }
  0x5e   :  { %390 = vmatpush1.bf16.msra.mxu0 %v2238_v5 }
  0x5f   :  { %391 = vmatprep.subr.bf16.mxu0 %v2241_v6 }
  0x60   :  { %1649 = vmatpush3.bf16.msra.mxu1 %v2259_v12 }
  0x61   :  { %1650 = vmatprep.subr.bf16.mxu1 %v2146_v0 }
  0x62   :  { %392 = vmatpush1.bf16.msra.mxu0 %v2244_v7 }
  0x63   :  { %393 = vmatprep.subr.bf16.mxu0 %v2247_v8 }
  0x64   :  { %1651 = vmatpush3.bf16.msra.mxu1 %v2265_v14 }
  0x65   :  { %1652 = vmatprep.subr.bf16.mxu1 %v2146_v0 }
  0x66   :  { %394 = vmatpush1.bf16.msra.mxu0 %v2252_v10 }
  0x67   :  { %395 = vmatprep.subr.bf16.mxu0 %v2256_v11 }
  0x68   :  { %1653 = vmatpush3.bf16.msra.mxu1 %v2275_v18 }
  0x69   :  { %1654 = vmatprep.subr.bf16.mxu1 %v2146_v0 }
  0x6a   :  { %396 = vmatpush1.bf16.msra.mxu0 %v2261_v13 }
  0x6b   :  { %397 = vmatprep.subr.bf16.mxu0 %v2268_v15 }
  0x6c   :  { %1655 = vmatpush3.bf16.msra.mxu1 %v2283_v20 }
  0x6d   :  { %1656 = vmatprep.subr.bf16.mxu1 %v2146_v0 }
  0x6e   :  { %398 = vmatpush1.bf16.msra.mxu0 %v2271_v16 }
  0x6f   :  { %399 = vmatprep.subr.bf16.mxu0 %v2273_v17 }
  0x70   :  { %1657 = vmatpush3.bf16.msra.mxu1 %v2295_v23 }
  0x71   :  { %1658 = vmatprep.subr.bf16.mxu1 %v2146_v0 }
  0x72   :  { %400 = vmatpush1.bf16.msra.mxu0 %v2281_v19 }
  0x73   :  { %401 = vmatprep.subr.bf16.mxu0 %v2288_v21 }
  0x74   :  { %1659 = vmatpush3.bf16.msra.mxu1 %v2301_v24 }
  0x75   :  { %1660 = vmatprep.subr.bf16.mxu1 %v2146_v0 }
  0x76   :  { %402 = vmatpush1.bf16.msra.mxu0 %v2292_v22 }
  0x77   :  { %525 = vmatprep.subr.bf16.mxu0 %v2230_v2 }
  0x78   :  { %1661 = vmatpush3.bf16.msra.mxu1 %v2306_v26 }
  0x79   :  { %1666 = vmatprep.subr.bf16.mxu1 %v2146_v0 }
 0x12c   :  { %v283_v31 = vpop.f32.mrb[0].mxu0 }
 0x12d   :  { %v333_v32 = vadd.f32 %v283_v31, %v114_v29  ;;  %v285_v33 = vpop.f32.mrb[1].mxu0 }
 0x12e   :  { %v287_v34 = vpop.f32.mrb[2].mxu0  ;;  %v326_v41 = vpop.f32.mrb[0].mxu1  ;;  %v347_v42 = vadd.f32 %v285_v33, %v115_v38 }
 0x12f   :  { %v1504_v35 = vmul.f32 -1.442695, %v333_v32  ;;  %v334_v36 = vadd.f32 %v287_v34, %v117_v30  ;;  %v289_v37 = vpop.f32.mrb[3].mxu0  ;;  %v1644_v43 = vpop.f32.mrb[1].mxu1  ;;  %v361_v55 = vadd.f32 %v2349_v53, %v326_v41 }
 0x130   :  { %v329_v44 = vpop.f32.mrb[2].mxu1  ;;  %v348_v45 = vadd.f32 %v289_v37, %v118_v40  ;;  %v1506_v47 = vmul.f32 -1.442695, %v347_v42  ;;  %v376_v42 = vld [vmem:[#allocation3 + $0x18] sm:$0xff]  ;;  %v378_v43 = vld [vmem:[#allocation3 + $0x24] sm:$0xff] }
 0x131   :  { %1860 = vpow2.f32 %v1504_v35  ;;  %v1505_v39 = vmul.f32 -1.442695, %v334_v36  ;;  %v1645_v46 = vpop.f32.mrb[3].mxu1  ;;  %v362_v62 = vadd.f32 %v2349_v53, %v329_v44  ;;  %v380_v44 = vunpack.c.l.bf16 %v376_v42 }
 0x132   :  { %v1507_v49 = vmul.f32 -1.442695, %v348_v45  ;;  %v383_v45 = vunpack.c.l.bf16 %v378_v43 }
 0x133   :  { %1862 = vpow2.f32 %v1505_v39 }
 0x134   :  { %1864 = vpow2.f32 %v1506_v47 }
 0x13b   :  { %v1861_v48 = vpop.eup %1860 }
 0x13c   :  { %v341_v50 = vadd.f32 1.0, %v1861_v48 }
 0x13d   :  { %v1863_v51 = vpop.eup %1862 }
 0x13e   :  { %1866 = vrcp.f32 %v341_v50  ;;  %v342_v52 = vadd.f32 1.0, %v1863_v51  ;;  %v1865_v56 = vpop.eup %1864 }
 0x13f   :  { %1868 = vpow2.f32 %v1507_v49  ;;  %v355_v25 = vadd.f32 1.0, %v1865_v56 }
 0x140   :  { %1870 = vrcp.f32 %v342_v52 }
 0x148   :  { %v1867_v58 = vpop.eup %1866 }
 0x149   :  { %v1869_v59 = vpop.eup %1868  ;;  %v363_v60 = vmul.f32 %v1867_v58, %v361_v55  ;;  %v381_v58 = vunpack.c.h.bf16 %v376_v42 }
 0x14a   :  { %v1871_v63 = vpop.eup %1870  ;;  %v356_v29 = vadd.f32 1.0, %v1869_v59 }
 0x14b   :  { %v365_v27 = vadd.f32 %v363_v60, %v116_v57  ;;  %v364_v28 = vmul.f32 %v1871_v63, %v362_v62  ;;  %v384_v60 = vunpack.c.h.bf16 %v378_v43 }
 0x14d   :  { %1872 = vtanh.f32 %v365_v27  ;;  %v366_v30 = vadd.f32 %v364_v28, %v119_v61 }
 0x14e   :  { %1874 = vrcp.f32 %v355_v25 }
 0x14f   :  { %1876 = vtanh.f32 %v366_v30 }
 0x150   :  { %1878 = vrcp.f32 %v356_v29 }
 0x157   :  { %v1873_v31 = vpop.eup %1872 }
 0x158   :  { %v1875_v32 = vpop.eup %1874  ;;  %v369_v33 = vsub.f32 0.0, %v1873_v31 }
 0x159   :  { %v1877_v34 = vpop.eup %1876 }
 0x15a   :  { %v370_v35 = vsub.f32 0.0, %v1877_v34  ;;  %v371_v36 = vmul.f32 %v1875_v32, %v369_v33  ;;  %v1879_v37 = vpop.eup %1878 }
 0x15c   :  { %v372_v38 = vmul.f32 %v1879_v37, %v370_v35  ;;  %v2353_v39 = vadd.f32 %v1873_v31, %v371_v36  ;;  %v377_v31 = vld [vmem:[#allocation3 + $0x20] ss:$12 sps:$4 sm:$0xff]  }
 0x15d   :  { %v382_v33 = vunpack.c.l.bf16 %v377_v31 }
 0x15e   :  { %v2355_v40 = vadd.f32 %v1877_v34, %v372_v38  ;;  %v385_v38 = vunpack.c.h.bf16 %v377_v31 }
 0x160   :  { %v386_v41 = vpack.c.bf16 %v2355_v40, %v2353_v39 }
 0x162   :  { %420 = vmatmul.mubr.bf16.vlgmr.msra.gmra.mrb[4].mxu0 %v386_v41  ;;  %1663 = vmatmul.mubr.bf16.vlgmr.msra.gmra.mrb[4].mxu1 %v386_v41 }
 0x163   :  { %526 = vmatpush1.bf16.msra.mxu0 %v2232_v3  ;;  %1667 = vmatpush3.bf16.msra.mxu1 %v2249_v9 }
 0x164   :  { %527 = vmatprep.subr.bf16.mxu0 %v2235_v4  ;;  %1668 = vmatprep.subr.bf16.mxu1 %v2146_v0 }
 0x165   :  { %557 = vmatprep.mubr.bf16.mxu0 %v2147_v1  ;;  %1682 = vmatprep.mubr.msk.bf16.mxu1 %vm2148_vm0, %v2146_v0 }
 0x167   :  { %528 = vmatpush1.bf16.msra.mxu0 %v2238_v5  ;;  %1669 = vmatpush3.bf16.msra.mxu1 %v2259_v12 }
 0x168   :  { %529 = vmatprep.subr.bf16.mxu0 %v2241_v6  ;;  %1670 = vmatprep.subr.bf16.mxu1 %v2146_v0 }
 0x16b   :  { %530 = vmatpush1.bf16.msra.mxu0 %v2244_v7  ;;  %1671 = vmatpush3.bf16.msra.mxu1 %v2265_v14 }
 0x16c   :  { %531 = vmatprep.subr.bf16.mxu0 %v2247_v8  ;;  %1672 = vmatprep.subr.bf16.mxu1 %v2146_v0 }
 0x16f   :  { %532 = vmatpush1.bf16.msra.mxu0 %v2252_v10  ;;  %1673 = vmatpush3.bf16.msra.mxu1 %v2275_v18 }
 0x170   :  { %533 = vmatprep.subr.bf16.mxu0 %v2256_v11  ;;  %1674 = vmatprep.subr.bf16.mxu1 %v2146_v0 }
 0x173   :  { %534 = vmatpush1.bf16.msra.mxu0 %v2261_v13  ;;  %1675 = vmatpush3.bf16.msra.mxu1 %v2283_v20 }
 0x174   :  { %535 = vmatprep.subr.bf16.mxu0 %v2268_v15  ;;  %1676 = vmatprep.subr.bf16.mxu1 %v2146_v0 }
 0x177   :  { %536 = vmatpush1.bf16.msra.mxu0 %v2271_v16  ;;  %1677 = vmatpush3.bf16.msra.mxu1 %v2295_v23 }
 0x178   :  { %537 = vmatprep.subr.bf16.mxu0 %v2273_v17  ;;  %1678 = vmatprep.subr.bf16.mxu1 %v2146_v0 }
 0x17b   :  { %538 = vmatpush1.bf16.msra.mxu0 %v2281_v19  ;;  %1679 = vmatpush3.bf16.msra.mxu1 %v2301_v24 }
 0x17c   :  { %539 = vmatprep.subr.bf16.mxu0 %v2288_v21  ;;  %1680 = vmatprep.subr.bf16.mxu1 %v2146_v0 }
 0x17f   :  { %540 = vmatpush1.bf16.msra.mxu0 %v2292_v22  ;;  %1681 = vmatpush3.bf16.msra.mxu1 %v2306_v26 }
 0x180   :  { %663 = vmatprep.subr.bf16.mxu0 %v2230_v2  ;;  %1686 = vmatprep.subr.bf16.mxu1 %v2146_v0 }
 0x235   :  { %v421_v46 = vpop.f32.mrb[4].mxu0  ;;  %v464_v47 = vpop.f32.mrb[4].mxu1 }
 0x236   :  { %v471_v48 = vadd.f32 %v421_v46, %v380_v44  ;;  %v423_v49 = vpop.f32.mrb[5].mxu0  ;;  %v1664_v50 = vpop.f32.mrb[5].mxu1  ;;  %v499_v34 = vadd.f32 %v2349_v53, %v464_v47 }
 0x237   :  { %v425_v51 = vpop.f32.mrb[6].mxu0  ;;  %v467_v52 = vpop.f32.mrb[6].mxu1  ;;  %v485_v61 = vadd.f32 %v423_v49, %v381_v58 }
 0x238   :  { %v1508_v54 = vmul.f32 -1.442695, %v471_v48  ;;  %v472_v55 = vadd.f32 %v425_v51, %v383_v45  ;;  %v427_v56 = vpop.f32.mrb[7].mxu0  ;;  %v1665_v57 = vpop.f32.mrb[7].mxu1  ;;  %v500_v41 = vadd.f32 %v2349_v53, %v467_v52 }
 0x239   :  { %v486_v62 = vadd.f32 %v427_v56, %v384_v60  ;;  %v1510_v63 = vmul.f32 -1.442695, %v485_v61 }
 0x23a   :  { %1880 = vpow2.f32 %v1508_v54  ;;  %v1509_v59 = vmul.f32 -1.442695, %v472_v55 }
 0x23b   :  { %v1511_v27 = vmul.f32 -1.442695, %v486_v62 }
 0x23c   :  { %1882 = vpow2.f32 %v1509_v59 }
 0x23d   :  { %1884 = vpow2.f32 %v1510_v63 }
 0x244   :  { %v1881_v25 = vpop.eup %1880 }
 0x245   :  { %v479_v28 = vadd.f32 1.0, %v1881_v25 }
 0x246   :  { %v1883_v29 = vpop.eup %1882 }
 0x247   :  { %1886 = vrcp.f32 %v479_v28  ;;  %v480_v30 = vadd.f32 1.0, %v1883_v29  ;;  %v1885_v32 = vpop.eup %1884 }
 0x248   :  { %1888 = vpow2.f32 %v1511_v27  ;;  %v493_v43 = vadd.f32 1.0, %v1885_v32 }
 0x249   :  { %1890 = vrcp.f32 %v480_v30 }
 0x251   :  { %v1887_v35 = vpop.eup %1886 }
 0x252   :  { %v1889_v36 = vpop.eup %1888  ;;  %v501_v37 = vmul.f32 %v1887_v35, %v499_v34 }
 0x253   :  { %v1891_v42 = vpop.eup %1890  ;;  %v494_v48 = vadd.f32 1.0, %v1889_v36 }
 0x254   :  { %v503_v44 = vadd.f32 %v501_v37, %v382_v33  ;;  %v502_v45 = vmul.f32 %v1891_v42, %v500_v41 }
 0x256   :  { %1892 = vtanh.f32 %v503_v44  ;;  %v504_v46 = vadd.f32 %v502_v45, %v385_v38 }
 0x257   :  { %1894 = vrcp.f32 %v493_v43 }
 0x258   :  { %1896 = vtanh.f32 %v504_v46 }
 0x259   :  { %1898 = vrcp.f32 %v494_v48 }
 0x260   :  { %v1893_v49 = vpop.eup %1892 }
 0x261   :  { %v1895_v50 = vpop.eup %1894  ;;  %v507_v47 = vsub.f32 %v2353_v39, %v1893_v49  ;;  %v514_v39 = vld [vmem:[#allocation3 + $0x30] sm:$0xff] }
 0x262   :  { %v1897_v51 = vpop.eup %1896  ;;  %v518_v60 = vunpack.c.l.bf16 %v514_v39  ;;  %v519_v35 = vunpack.c.h.bf16 %v514_v39 }
 0x263   :  { %v508_v54 = vsub.f32 %v2355_v40, %v1897_v51  ;;  %v509_v55 = vmul.f32 %v1895_v50, %v507_v47  ;;  %v1899_v56 = vpop.eup %1898  ;;  %v516_v40 = vld [vmem:[#allocation3 + $0x3c] sm:$0xff] }
 0x264   :  { %v521_v61 = vunpack.c.l.bf16 %v516_v40  ;;  %v522_v37 = vunpack.c.h.bf16 %v516_v40 }
 0x265   :  { %v510_v52 = vmul.f32 %v1899_v56, %v508_v54  ;;  %v2398_v57 = vadd.f32 %v1893_v49, %v509_v55  ;;  %v515_v49 = vld [vmem:[#allocation3 + $0x38] ss:$12 sps:$4 sm:$0xff]  }
 0x266   :  { %v520_v47 = vunpack.c.l.bf16 %v515_v49 }
 0x267   :  { %v2400_v58 = vadd.f32 %v1897_v51, %v510_v52  ;;  %v523_v52 = vunpack.c.h.bf16 %v515_v49 }
 0x269   :  { %v524_v59 = vpack.c.bf16 %v2400_v58, %v2398_v57 }
 0x26b   :  { %558 = vmatmul.mubr.bf16.vlgmr.msra.gmra.mrb[8].mxu0 %v524_v59  ;;  %1683 = vmatmul.mubr.bf16.vlgmr.msra.gmra.mrb[8].mxu1 %v524_v59 }
 0x26c   :  { %664 = vmatpush1.bf16.msra.mxu0 %v2232_v3  ;;  %1687 = vmatpush3.bf16.msra.mxu1 %v2249_v9 }
 0x26d   :  { %665 = vmatprep.subr.bf16.mxu0 %v2235_v4  ;;  %1688 = vmatprep.subr.bf16.mxu1 %v2146_v0 }
 0x26e   :  { %695 = vmatprep.mubr.bf16.mxu0 %v2147_v1  ;;  %1702 = vmatprep.mubr.msk.bf16.mxu1 %vm2148_vm0, %v2146_v0 }
 0x270   :  { %666 = vmatpush1.bf16.msra.mxu0 %v2238_v5  ;;  %1689 = vmatpush3.bf16.msra.mxu1 %v2259_v12 }
 0x271   :  { %667 = vmatprep.subr.bf16.mxu0 %v2241_v6  ;;  %1690 = vmatprep.subr.bf16.mxu1 %v2146_v0 }
 0x274   :  { %668 = vmatpush1.bf16.msra.mxu0 %v2244_v7  ;;  %1691 = vmatpush3.bf16.msra.mxu1 %v2265_v14 }
 0x275   :  { %669 = vmatprep.subr.bf16.mxu0 %v2247_v8  ;;  %1692 = vmatprep.subr.bf16.mxu1 %v2146_v0 }
 0x278   :  { %670 = vmatpush1.bf16.msra.mxu0 %v2252_v10  ;;  %1693 = vmatpush3.bf16.msra.mxu1 %v2275_v18 }
 0x279   :  { %671 = vmatprep.subr.bf16.mxu0 %v2256_v11  ;;  %1694 = vmatprep.subr.bf16.mxu1 %v2146_v0 }
 0x27c   :  { %672 = vmatpush1.bf16.msra.mxu0 %v2261_v13  ;;  %1695 = vmatpush3.bf16.msra.mxu1 %v2283_v20 }
 0x27d   :  { %673 = vmatprep.subr.bf16.mxu0 %v2268_v15  ;;  %1696 = vmatprep.subr.bf16.mxu1 %v2146_v0 }
 0x280   :  { %674 = vmatpush1.bf16.msra.mxu0 %v2271_v16  ;;  %1697 = vmatpush3.bf16.msra.mxu1 %v2295_v23 }
 0x281   :  { %675 = vmatprep.subr.bf16.mxu0 %v2273_v17  ;;  %1698 = vmatprep.subr.bf16.mxu1 %v2146_v0 }
 0x284   :  { %676 = vmatpush1.bf16.msra.mxu0 %v2281_v19  ;;  %1699 = vmatpush3.bf16.msra.mxu1 %v2301_v24 }
 0x285   :  { %677 = vmatprep.subr.bf16.mxu0 %v2288_v21  ;;  %1700 = vmatprep.subr.bf16.mxu1 %v2146_v0 }
 0x288   :  { %678 = vmatpush1.bf16.msra.mxu0 %v2292_v22  ;;  %1701 = vmatpush3.bf16.msra.mxu1 %v2306_v26 }
 0x289   :  { %801 = vmatprep.subr.bf16.mxu0 %v2230_v2  ;;  %1706 = vmatprep.subr.bf16.mxu1 %v2146_v0 }
 0x33e   :  { %v559_v62 = vpop.f32.mrb[8].mxu0  ;;  %v602_v63 = vpop.f32.mrb[8].mxu1 }
 0x33f   :  { %v609_v25 = vadd.f32 %v559_v62, %v518_v60  ;;  %v561_v27 = vpop.f32.mrb[9].mxu0  ;;  %v1684_v28 = vpop.f32.mrb[9].mxu1  ;;  %v637_v51 = vadd.f32 %v2349_v53, %v602_v63 }
 0x340   :  { %v563_v29 = vpop.f32.mrb[10].mxu0  ;;  %v605_v30 = vpop.f32.mrb[10].mxu1  ;;  %v623_v38 = vadd.f32 %v561_v27, %v519_v35 }
 0x341   :  { %v1512_v31 = vmul.f32 -1.442695, %v609_v25  ;;  %v610_v32 = vadd.f32 %v563_v29, %v521_v61  ;;  %v565_v33 = vpop.f32.mrb[11].mxu0  ;;  %v1685_v34 = vpop.f32.mrb[11].mxu1  ;;  %v638_v59 = vadd.f32 %v2349_v53, %v605_v30 }
 0x342   :  { %v624_v41 = vadd.f32 %v565_v33, %v522_v37  ;;  %v1514_v42 = vmul.f32 -1.442695, %v623_v38 }
 0x343   :  { %1900 = vpow2.f32 %v1512_v31  ;;  %v1513_v36 = vmul.f32 -1.442695, %v610_v32 }
 0x344   :  { %v1515_v44 = vmul.f32 -1.442695, %v624_v41 }
 0x345   :  { %1902 = vpow2.f32 %v1513_v36 }
 0x346   :  { %1904 = vpow2.f32 %v1514_v42 }
 0x34d   :  { %v1901_v43 = vpop.eup %1900 }
 0x34e   :  { %v617_v45 = vadd.f32 1.0, %v1901_v43 }
 0x34f   :  { %v1903_v46 = vpop.eup %1902 }
 0x350   :  { %1906 = vrcp.f32 %v617_v45  ;;  %v618_v48 = vadd.f32 1.0, %v1903_v46  ;;  %v1905_v50 = vpop.eup %1904 }
 0x351   :  { %1908 = vpow2.f32 %v1515_v44  ;;  %v631_v40 = vadd.f32 1.0, %v1905_v50 }
 0x352   :  { %1910 = vrcp.f32 %v618_v48 }
 0x35a   :  { %v1907_v54 = vpop.eup %1906 }
 0x35b   :  { %v1909_v55 = vpop.eup %1908  ;;  %v639_v56 = vmul.f32 %v1907_v54, %v637_v51 }
 0x35c   :  { %v1911_v39 = vpop.eup %1910  ;;  %v632_v25 = vadd.f32 1.0, %v1909_v55 }
 0x35d   :  { %v641_v60 = vadd.f32 %v639_v56, %v520_v47  ;;  %v640_v61 = vmul.f32 %v1911_v39, %v638_v59 }
 0x35f   :  { %1912 = vtanh.f32 %v641_v60  ;;  %v642_v62 = vadd.f32 %v640_v61, %v523_v52 }
 0x360   :  { %1914 = vrcp.f32 %v631_v40 }
 0x361   :  { %1916 = vtanh.f32 %v642_v62 }
 0x362   :  { %1918 = vrcp.f32 %v632_v25  ;;  %v653_v25 = vld [vmem:[#allocation3 + $0x50] ss:$12 sps:$4 sm:$0xff]  }
 0x369   :  { %v1913_v27 = vpop.eup %1912 }
 0x36a   :  { %v1915_v28 = vpop.eup %1914  ;;  %v645_v63 = vsub.f32 %v2398_v57, %v1913_v27  ;;  %v652_v57 = vld [vmem:[#allocation3 + $0x48] sm:$0xff] }
 0x36b   :  { %v1917_v29 = vpop.eup %1916  ;;  %v656_v37 = vunpack.c.l.bf16 %v652_v57  ;;  %v657_v54 = vunpack.c.h.bf16 %v652_v57 }
 0x36c   :  { %v646_v31 = vsub.f32 %v2400_v58, %v1917_v29  ;;  %v647_v32 = vmul.f32 %v1915_v28, %v645_v63  ;;  %v1919_v33 = vpop.eup %1918  ;;  %v654_v58 = vld [vmem:[#allocation3 + $0x54] sm:$0xff]  ;;  %v658_v28 = vunpack.c.l.bf16 %v653_v25 }
 0x36d   :  { %v659_v38 = vunpack.c.l.bf16 %v654_v58  ;;  %v660_v55 = vunpack.c.h.bf16 %v654_v58 }
 0x36e   :  { %v648_v30 = vmul.f32 %v1919_v33, %v646_v31  ;;  %v2443_v34 = vadd.f32 %v1913_v27, %v647_v32  ;;  %v661_v33 = vunpack.c.h.bf16 %v653_v25 }
 0x370   :  { %v2445_v35 = vadd.f32 %v1917_v29, %v648_v30 }
 0x372   :  { %v662_v36 = vpack.c.bf16 %v2445_v35, %v2443_v34 }
 0x374   :  { %696 = vmatmul.mubr.bf16.vlgmr.msra.gmra.mrb[12].mxu0 %v662_v36  ;;  %1703 = vmatmul.mubr.bf16.vlgmr.msra.gmra.mrb[12].mxu1 %v662_v36 }
 0x375   :  { %802 = vmatpush1.bf16.msra.mxu0 %v2232_v3  ;;  %1707 = vmatpush3.bf16.msra.mxu1 %v2249_v9 }
 0x376   :  { %803 = vmatprep.subr.bf16.mxu0 %v2235_v4  ;;  %1708 = vmatprep.subr.bf16.mxu1 %v2146_v0 }
 0x377   :  { %833 = vmatprep.mubr.bf16.mxu0 %v2147_v1  ;;  %1722 = vmatprep.mubr.msk.bf16.mxu1 %vm2148_vm0, %v2146_v0 }
 0x379   :  { %804 = vmatpush1.bf16.msra.mxu0 %v2238_v5  ;;  %1709 = vmatpush3.bf16.msra.mxu1 %v2259_v12 }
 0x37a   :  { %805 = vmatprep.subr.bf16.mxu0 %v2241_v6  ;;  %1710 = vmatprep.subr.bf16.mxu1 %v2146_v0 }
 0x37d   :  { %806 = vmatpush1.bf16.msra.mxu0 %v2244_v7  ;;  %1711 = vmatpush3.bf16.msra.mxu1 %v2265_v14 }
 0x37e   :  { %807 = vmatprep.subr.bf16.mxu0 %v2247_v8  ;;  %1712 = vmatprep.subr.bf16.mxu1 %v2146_v0 }
 0x381   :  { %808 = vmatpush1.bf16.msra.mxu0 %v2252_v10  ;;  %1713 = vmatpush3.bf16.msra.mxu1 %v2275_v18 }
 0x382   :  { %809 = vmatprep.subr.bf16.mxu0 %v2256_v11  ;;  %1714 = vmatprep.subr.bf16.mxu1 %v2146_v0 }
 0x385   :  { %810 = vmatpush1.bf16.msra.mxu0 %v2261_v13  ;;  %1715 = vmatpush3.bf16.msra.mxu1 %v2283_v20 }
 0x386   :  { %811 = vmatprep.subr.bf16.mxu0 %v2268_v15  ;;  %1716 = vmatprep.subr.bf16.mxu1 %v2146_v0 }
 0x389   :  { %812 = vmatpush1.bf16.msra.mxu0 %v2271_v16  ;;  %1717 = vmatpush3.bf16.msra.mxu1 %v2295_v23 }
 0x38a   :  { %813 = vmatprep.subr.bf16.mxu0 %v2273_v17  ;;  %1718 = vmatprep.subr.bf16.mxu1 %v2146_v0 }
 0x38d   :  { %814 = vmatpush1.bf16.msra.mxu0 %v2281_v19  ;;  %1719 = vmatpush3.bf16.msra.mxu1 %v2301_v24 }
 0x38e   :  { %815 = vmatprep.subr.bf16.mxu0 %v2288_v21  ;;  %1720 = vmatprep.subr.bf16.mxu1 %v2146_v0 }
 0x391   :  { %816 = vmatpush1.bf16.msra.mxu0 %v2292_v22  ;;  %1721 = vmatpush3.bf16.msra.mxu1 %v2306_v26 }
 0x392   :  { %939 = vmatprep.subr.bf16.mxu0 %v2230_v2  ;;  %1726 = vmatprep.subr.bf16.mxu1 %v2146_v0 }
 0x447   :  { %v697_v41 = vpop.f32.mrb[12].mxu0  ;;  %v740_v42 = vpop.f32.mrb[12].mxu1 }
 0x448   :  { %v747_v43 = vadd.f32 %v697_v41, %v656_v37  ;;  %v699_v44 = vpop.f32.mrb[13].mxu0  ;;  %v1704_v45 = vpop.f32.mrb[13].mxu1  ;;  %v775_v63 = vadd.f32 %v2349_v53, %v740_v42 }
 0x449   :  { %v701_v46 = vpop.f32.mrb[14].mxu0  ;;  %v743_v48 = vpop.f32.mrb[14].mxu1  ;;  %v761_v56 = vadd.f32 %v699_v44, %v657_v54 }
 0x44a   :  { %v1516_v49 = vmul.f32 -1.442695, %v747_v43  ;;  %v748_v50 = vadd.f32 %v701_v46, %v659_v38  ;;  %v703_v47 = vpop.f32.mrb[15].mxu0  ;;  %v1705_v51 = vpop.f32.mrb[15].mxu1  ;;  %v776_v30 = vadd.f32 %v2349_v53, %v743_v48 }
 0x44b   :  { %v762_v52 = vadd.f32 %v703_v47, %v660_v55  ;;  %v1518_v59 = vmul.f32 -1.442695, %v761_v56  ;;  %v791_v56 = vld [vmem:[#allocation3 + $0x68] ss:$12 sps:$4 sm:$0xff]  }
 0x44c   :  { %1920 = vpow2.f32 %v1516_v49  ;;  %v1517_v2 = vmul.f32 -1.442695, %v748_v50 }
 0x44d   :  { %v1519_v40 = vmul.f32 -1.442695, %v762_v52 }
 0x44e   :  { %1922 = vpow2.f32 %v1517_v2 }
 0x44f   :  { %1924 = vpow2.f32 %v1518_v59  ;;  %v796_v59 = vunpack.c.l.bf16 %v791_v56 }
 0x456   :  { %v1921_v39 = vpop.eup %1920 }
 0x457   :  { %v755_v60 = vadd.f32 1.0, %v1921_v39 }
 0x458   :  { %v1923_v61 = vpop.eup %1922 }
 0x459   :  { %1926 = vrcp.f32 %v755_v60  ;;  %v756_v62 = vadd.f32 1.0, %v1923_v61  ;;  %v1925_v27 = vpop.eup %1924 }
 0x45a   :  { %1928 = vpow2.f32 %v1519_v40  ;;  %v769_v57 = vadd.f32 1.0, %v1925_v27 }
 0x45b   :  { %1930 = vrcp.f32 %v756_v62  ;;  %v799_v62 = vunpack.c.h.bf16 %v791_v56 }
 0x463   :  { %v1927_v29 = vpop.eup %1926 }
 0x464   :  { %v1929_v31 = vpop.eup %1928  ;;  %v777_v32 = vmul.f32 %v1927_v29, %v775_v63 }
 0x465   :  { %v1931_v36 = vpop.eup %1930  ;;  %v770_v41 = vadd.f32 1.0, %v1929_v31 }
 0x466   :  { %v779_v58 = vadd.f32 %v777_v32, %v658_v28  ;;  %v778_v37 = vmul.f32 %v1931_v36, %v776_v30 }
 0x468   :  { %1932 = vtanh.f32 %v779_v58  ;;  %v780_v38 = vadd.f32 %v778_v37, %v661_v33 }
 0x469   :  { %1934 = vrcp.f32 %v769_v57 }
 0x46a   :  { %1936 = vtanh.f32 %v780_v38 }
 0x46b   :  { %1938 = vrcp.f32 %v770_v41 }
 0x472   :  { %v1933_v43 = vpop.eup %1932 }
 0x473   :  { %v1935_v44 = vpop.eup %1934  ;;  %v783_v42 = vsub.f32 %v2443_v34, %v1933_v43 }
 0x474   :  { %v1937_v45 = vpop.eup %1936 }
 0x475   :  { %v784_v46 = vsub.f32 %v2445_v35, %v1937_v45  ;;  %v785_v49 = vmul.f32 %v1935_v44, %v783_v42  ;;  %v1939_v50 = vpop.eup %1938 }
 0x477   :  { %v786_v48 = vmul.f32 %v1939_v50, %v784_v46  ;;  %v2488_v47 = vadd.f32 %v1933_v43, %v785_v49  ;;  %v2544_v46 = vld [vmem:[#allocation6 + $0x8] ss:$12 sps:$4 sm:$0xff]   ;;  %v2554_v50 = vld [vmem:[#allocation6 + $0x18] ss:$12 sps:$4 sm:$0xff]  }
 0x478   :  { %v2547_v49 = vld [vmem:[#allocation6 + $0x1c] ss:$12 sps:$4 sm:$0xff]  }
 0x479   :  { %v2490_v51 = vadd.f32 %v1937_v45, %v786_v48  ;;  %v2541_v45 = vld [vmem:[#allocation6] ss:$12 sps:$4 sm:$0xff]  }
 0x47a   :  { %v2557_v48 = vld [vmem:[#allocation6 + $0x20] ss:$12 sps:$4 sm:$0xff]  }
 0x47b   :  { %v800_v54 = vpack.c.bf16 %v2490_v51, %v2488_v47 }
 0x47d   :  { %834 = vmatmul.mubr.bf16.vlgmr.msra.gmra.mrb[16].mxu0 %v800_v54  ;;  %1723 = vmatmul.mubr.bf16.vlgmr.msra.gmra.mrb[16].mxu1 %v800_v54  ;;  %v2567_v54 = vld [vmem:[#allocation6 + $0x38] ss:$12 sps:$4 sm:$0xff]  }
 0x47e   :  { %940 = vmatpush1.bf16.msra.mxu0 %v2232_v3  ;;  %1727 = vmatpush3.bf16.msra.mxu1 %v2249_v9  ;;  %v2527_v3 = vld [vmem:[#allocation6 + $0x4] ss:$12 sps:$4 sm:$0xff]  }
 0x47f   :  { %941 = vmatprep.subr.bf16.mxu0 %v2235_v4  ;;  %1728 = vmatprep.subr.bf16.mxu1 %v2146_v0  ;;  %v790_v4 = vld [vmem:[#allocation3 + $0x60] sm:$0xff] }
 0x480   :  { %971 = vmatprep.mubr.bf16.mxu0 %v2147_v1  ;;  %1742 = vmatprep.mubr.msk.bf16.mxu1 %vm2148_vm0, %v2146_v0 }
 0x482   :  { %942 = vmatpush1.bf16.msra.mxu0 %v2238_v5  ;;  %1729 = vmatpush3.bf16.msra.mxu1 %v2259_v12  ;;  %v792_v5 = vld [vmem:[#allocation3 + $0x6c] sm:$0xff] }
 0x483   :  { %943 = vmatprep.subr.bf16.mxu0 %v2241_v6  ;;  %1730 = vmatprep.subr.bf16.mxu1 %v2146_v0  ;;  %v794_v6 = vunpack.c.l.bf16 %v790_v4 }
 0x486   :  { %944 = vmatpush1.bf16.msra.mxu0 %v2244_v7  ;;  %1731 = vmatpush3.bf16.msra.mxu1 %v2265_v14  ;;  %v797_v7 = vunpack.c.l.bf16 %v792_v5 }
 0x487   :  { %945 = vmatprep.subr.bf16.mxu0 %v2247_v8  ;;  %1732 = vmatprep.subr.bf16.mxu1 %v2146_v0 }
 0x48a   :  { %946 = vmatpush1.bf16.msra.mxu0 %v2252_v10  ;;  %1733 = vmatpush3.bf16.msra.mxu1 %v2275_v18 }
 0x48b   :  { %947 = vmatprep.subr.bf16.mxu0 %v2256_v11  ;;  %1734 = vmatprep.subr.bf16.mxu1 %v2146_v0 }
 0x48e   :  { %948 = vmatpush1.bf16.msra.mxu0 %v2261_v13  ;;  %1735 = vmatpush3.bf16.msra.mxu1 %v2283_v20 }
 0x48f   :  { %949 = vmatprep.subr.bf16.mxu0 %v2268_v15  ;;  %1736 = vmatprep.subr.bf16.mxu1 %v2146_v0 }
 0x492   :  { %950 = vmatpush1.bf16.msra.mxu0 %v2271_v16  ;;  %1737 = vmatpush3.bf16.msra.mxu1 %v2295_v23 }
 0x493   :  { %951 = vmatprep.subr.bf16.mxu0 %v2273_v17  ;;  %1738 = vmatprep.subr.bf16.mxu1 %v2146_v0 }
 0x496   :  { %952 = vmatpush1.bf16.msra.mxu0 %v2281_v19  ;;  %1739 = vmatpush3.bf16.msra.mxu1 %v2301_v24  ;;  %v795_v19 = vunpack.c.h.bf16 %v790_v4  ;;  %v2570_v4 = vld [vmem:[#allocation6 + $0x4c] ss:$12 sps:$4 sm:$0xff]  }
 0x497   :  { %953 = vmatprep.subr.bf16.mxu0 %v2288_v21  ;;  %1740 = vmatprep.subr.bf16.mxu1 %v2146_v0  ;;  %v798_v21 = vunpack.c.h.bf16 %v792_v5  ;;  %v2574_v5 = vld [vmem:[#allocation6 + $0x48] ss:$12 sps:$4 sm:$0xff]  }
 0x49a   :  { %954 = vmatpush1.bf16.msra.mxu0 %v2292_v22  ;;  %1741 = vmatpush3.bf16.msra.mxu1 %v2306_v26 }
 0x49b   :  { %1077 = vmatprep.subr.bf16.mxu0 %v2527_v3  ;;  %1746 = vmatprep.subr.bf16.mxu1 %v2146_v0 }
 0x550   :  { %v835_v8 = vpop.f32.mrb[16].mxu0  ;;  %v878_v9 = vpop.f32.mrb[16].mxu1 }
 0x551   :  { %v885_v10 = vadd.f32 %v835_v8, %v794_v6  ;;  %v837_v11 = vpop.f32.mrb[17].mxu0  ;;  %v1724_v12 = vpop.f32.mrb[17].mxu1  ;;  %v913_v39 = vadd.f32 %v2349_v53, %v878_v9  ;;  %v2577_v6 = vld [vmem:[#allocation6 + $0x50] ss:$12 sps:$4 sm:$0xff]   ;;  %v2584_v8 = vld [vmem:[#allocation6 + $0x60] ss:$12 sps:$4 sm:$0xff]  }
 0x552   :  { %v839_v13 = vpop.f32.mrb[18].mxu0  ;;  %v881_v14 = vpop.f32.mrb[18].mxu1  ;;  %v899_v22 = vadd.f32 %v837_v11, %v795_v19  ;;  %v2587_v9 = vld [vmem:[#allocation6 + $0x68] ss:$12 sps:$4 sm:$0xff]   ;;  %v2594_v11 = vld [vmem:[#allocation6 + $0x78] ss:$12 sps:$4 sm:$0xff]  }
 0x553   :  { %v1520_v15 = vmul.f32 -1.442695, %v885_v10  ;;  %v886_v16 = vadd.f32 %v839_v13, %v797_v7  ;;  %v841_v17 = vpop.f32.mrb[19].mxu0  ;;  %v1725_v18 = vpop.f32.mrb[19].mxu1  ;;  %v914_v25 = vadd.f32 %v2349_v53, %v881_v14  ;;  %v2580_v7 = vld [vmem:[#allocation6 + $0x64] ss:$12 sps:$4 sm:$0xff]  }
 0x554   :  { %v900_v23 = vadd.f32 %v841_v17, %v798_v21  ;;  %v1522_v24 = vmul.f32 -1.442695, %v899_v22  ;;  %v2590_v10 = vld [vmem:[#allocation6 + $0x7c] ss:$12 sps:$4 sm:$0xff]   ;;  %v2597_v12 = vld [vmem:[#allocation6 + $0x80] ss:$12 sps:$4 sm:$0xff]  }
 0x555   :  { %1940 = vpow2.f32 %v1520_v15  ;;  %v1521_v20 = vmul.f32 -1.442695, %v886_v16  ;;  %v2600_v13 = vld [vmem:[#allocation6 + $0x94] ss:$12 sps:$4 sm:$0xff]   ;;  %v2604_v14 = vld [vmem:[#allocation6 + $0x90] ss:$12 sps:$4 sm:$0xff]  }
 0x556   :  { %v1523_v34 = vmul.f32 -1.442695, %v900_v23  ;;  %v2607_v15 = vld [vmem:[#allocation6 + $0x98] ss:$12 sps:$4 sm:$0xff]   ;;  %v2614_v17 = vld [vmem:[#allocation6 + $0xa8] ss:$12 sps:$4 sm:$0xff]  }
 0x557   :  { %1942 = vpow2.f32 %v1521_v20  ;;  %v2610_v16 = vld [vmem:[#allocation6 + $0xac] ss:$12 sps:$4 sm:$0xff]   ;;  %v2617_v18 = vld [vmem:[#allocation6 + $0xb0] ss:$12 sps:$4 sm:$0xff]   ;;  %v930_v20 = vld [vmem:[#allocation3 + $0x84] sm:$0xff] }
 0x558   :  { %1944 = vpow2.f32 %v1522_v24  ;;  %v928_v19 = vld [vmem:[#allocation3 + $0x78] sm:$0xff]  ;;  %v935_v22 = vunpack.c.l.bf16 %v930_v20 }
 0x559   :  { %v932_v21 = vunpack.c.l.bf16 %v928_v19 }
 0x55f   :  { %v1941_v26 = vpop.eup %1940 }
 0x560   :  { %v893_v35 = vadd.f32 1.0, %v1941_v26 }
 0x561   :  { %v1943_v2 = vpop.eup %1942 }
 0x562   :  { %1946 = vrcp.f32 %v893_v35  ;;  %v894_v55 = vadd.f32 1.0, %v1943_v2  ;;  %v1945_v52 = vpop.eup %1944 }
 0x563   :  { %1948 = vpow2.f32 %v1523_v34  ;;  %v907_v28 = vadd.f32 1.0, %v1945_v52 }
 0x564   :  { %1950 = vrcp.f32 %v894_v55 }
 0x56c   :  { %v1947_v40 = vpop.eup %1946 }
 0x56d   :  { %v1949_v60 = vpop.eup %1948  ;;  %v915_v61 = vmul.f32 %v1947_v40, %v913_v39  ;;  %v933_v40 = vunpack.c.h.bf16 %v928_v19 }
 0x56e   :  { %v1951_v27 = vpop.eup %1950  ;;  %v908_v32 = vadd.f32 1.0, %v1949_v60  ;;  %v936_v60 = vunpack.c.h.bf16 %v930_v20 }
 0x56f   :  { %v917_v63 = vadd.f32 %v915_v61, %v796_v59  ;;  %v916_v29 = vmul.f32 %v1951_v27, %v914_v25 }
 0x571   :  { %1952 = vtanh.f32 %v917_v63  ;;  %v918_v31 = vadd.f32 %v916_v29, %v799_v62 }
 0x572   :  { %1954 = vrcp.f32 %v907_v28 }
 0x573   :  { %1956 = vtanh.f32 %v918_v31 }
 0x574   :  { %1958 = vrcp.f32 %v908_v32  ;;  %v929_v32 = vld [vmem:[#allocation3 + $0x80] ss:$12 sps:$4 sm:$0xff]  }
 0x57b   :  { %v1953_v33 = vpop.eup %1952 }
 0x57c   :  { %v1955_v30 = vpop.eup %1954  ;;  %v921_v36 = vsub.f32 %v2488_v47, %v1953_v33  ;;  %v2560_v47 = vld [vmem:[#allocation6 + $0x34] ss:$12 sps:$4 sm:$0xff]  }
 0x57d   :  { %v1957_v57 = vpop.eup %1956 }
 0x57e   :  { %v922_v58 = vsub.f32 %v2490_v51, %v1957_v57  ;;  %v923_v37 = vmul.f32 %v1955_v30, %v921_v36  ;;  %v1959_v38 = vpop.eup %1958  ;;  %v2564_v51 = vld [vmem:[#allocation6 + $0x30] ss:$12 sps:$4 sm:$0xff]   ;;  %v934_v30 = vunpack.c.l.bf16 %v929_v32 }
 0x580   :  { %v924_v41 = vmul.f32 %v1959_v38, %v922_v58  ;;  %v2535_v43 = vadd.f32 %v1953_v33, %v923_v37  ;;  %v937_v38 = vunpack.c.h.bf16 %v929_v32 }
 0x582   :  { %v2537_v44 = vadd.f32 %v1957_v57, %v924_v41 }
 0x584   :  { %v938_v42 = vpack.c.bf16 %v2537_v44, %v2535_v43 }
 0x586   :  { %972 = vmatmul.mubr.bf16.vlgmr.msra.gmra.mrb[20].mxu0 %v938_v42  ;;  %1743 = vmatmul.mubr.bf16.vlgmr.msra.gmra.mrb[20].mxu1 %v938_v42 }
 0x587   :  { %1078 = vmatpush1.bf16.msra.mxu0 %v2541_v45  ;;  %1747 = vmatpush3.bf16.msra.mxu1 %v2544_v46 }
 0x588   :  { %1079 = vmatprep.subr.bf16.mxu0 %v2547_v49  ;;  %1748 = vmatprep.subr.bf16.mxu1 %v2146_v0 }
 0x589   :  { %1109 = vmatprep.mubr.bf16.mxu0 %v2147_v1  ;;  %1762 = vmatprep.mubr.msk.bf16.mxu1 %vm2148_vm0, %v2146_v0 }
 0x58b   :  { %1080 = vmatpush1.bf16.msra.mxu0 %v2554_v50  ;;  %1749 = vmatpush3.bf16.msra.mxu1 %v2557_v48 }
 0x58c   :  { %1081 = vmatprep.subr.bf16.mxu0 %v2560_v47  ;;  %1750 = vmatprep.subr.bf16.mxu1 %v2146_v0 }
 0x58f   :  { %1082 = vmatpush1.bf16.msra.mxu0 %v2564_v51  ;;  %1751 = vmatpush3.bf16.msra.mxu1 %v2567_v54 }
 0x590   :  { %1083 = vmatprep.subr.bf16.mxu0 %v2570_v4  ;;  %1752 = vmatprep.subr.bf16.mxu1 %v2146_v0 }
 0x593   :  { %1084 = vmatpush1.bf16.msra.mxu0 %v2574_v5  ;;  %1753 = vmatpush3.bf16.msra.mxu1 %v2577_v6 }
 0x594   :  { %1085 = vmatprep.subr.bf16.mxu0 %v2580_v7  ;;  %1754 = vmatprep.subr.bf16.mxu1 %v2146_v0 }
 0x597   :  { %1086 = vmatpush1.bf16.msra.mxu0 %v2584_v8  ;;  %1755 = vmatpush3.bf16.msra.mxu1 %v2587_v9 }
 0x598   :  { %1087 = vmatprep.subr.bf16.mxu0 %v2590_v10  ;;  %1756 = vmatprep.subr.bf16.mxu1 %v2146_v0 }
 0x59b   :  { %1088 = vmatpush1.bf16.msra.mxu0 %v2594_v11  ;;  %1757 = vmatpush3.bf16.msra.mxu1 %v2597_v12 }
 0x59c   :  { %1089 = vmatprep.subr.bf16.mxu0 %v2600_v13  ;;  %1758 = vmatprep.subr.bf16.mxu1 %v2146_v0 }
 0x59f   :  { %1090 = vmatpush1.bf16.msra.mxu0 %v2604_v14  ;;  %1759 = vmatpush3.bf16.msra.mxu1 %v2607_v15 }
 0x5a0   :  { %1091 = vmatprep.subr.bf16.mxu0 %v2610_v16  ;;  %1760 = vmatprep.subr.bf16.mxu1 %v2146_v0 }
 0x5a3   :  { %1092 = vmatpush1.bf16.msra.mxu0 %v2614_v17  ;;  %1761 = vmatpush3.bf16.msra.mxu1 %v2617_v18 }
 0x5a4   :  { %1215 = vmatprep.subr.bf16.mxu0 %v2527_v3  ;;  %1766 = vmatprep.subr.bf16.mxu1 %v2146_v0 }
 0x659   :  { %v973_v23 = vpop.f32.mrb[20].mxu0  ;;  %v1016_v24 = vpop.f32.mrb[20].mxu1 }
 0x65a   :  { %v1023_v26 = vadd.f32 %v973_v23, %v932_v21  ;;  %v975_v34 = vpop.f32.mrb[21].mxu0  ;;  %v1744_v35 = vpop.f32.mrb[21].mxu1  ;;  %v1051_v36 = vadd.f32 %v2349_v53, %v1016_v24 }
 0x65b   :  { %v977_v2 = vpop.f32.mrb[22].mxu0  ;;  %v1019_v55 = vpop.f32.mrb[22].mxu1  ;;  %v1037_v61 = vadd.f32 %v975_v34, %v933_v40  ;;  %v1067_v40 = vld [vmem:[#allocation3 + $0x98] ss:$12 sps:$4 sm:$0xff]  }
 0x65c   :  { %v1524_v56 = vmul.f32 -1.442695, %v1023_v26  ;;  %v1024_v52 = vadd.f32 %v977_v2, %v935_v22  ;;  %v979_v59 = vpop.f32.mrb[23].mxu0  ;;  %v1745_v39 = vpop.f32.mrb[23].mxu1  ;;  %v1052_v41 = vadd.f32 %v2349_v53, %v1019_v55 }
 0x65d   :  { %v1038_v62 = vadd.f32 %v979_v59, %v936_v60  ;;  %v1526_v25 = vmul.f32 -1.442695, %v1037_v61  ;;  %v1072_v60 = vunpack.c.l.bf16 %v1067_v40  ;;  %v2669_v61 = vld [vmem:[%s2711_s2] ss:$0 sm:$0xff] }
 0x65e   :  { %1960 = vpow2.f32 %v1524_v56  ;;  %v1525_v3 = vmul.f32 -1.442695, %v1024_v52 }
 0x65f   :  { %v1527_v28 = vmul.f32 -1.442695, %v1038_v62 }
 0x660   :  { %1962 = vpow2.f32 %v1525_v3 }
 0x661   :  { %1964 = vpow2.f32 %v1526_v25 }
 0x668   :  { %v1961_v27 = vpop.eup %1960 }
 0x669   :  { %v1031_v63 = vadd.f32 1.0, %v1961_v27 }
 0x66a   :  { %v1963_v29 = vpop.eup %1962 }
 0x66b   :  { %1966 = vrcp.f32 %v1031_v63  ;;  %v1032_v31 = vadd.f32 1.0, %v1963_v29  ;;  %v1965_v33 = vpop.eup %1964  ;;  %v1075_v63 = vunpack.c.h.bf16 %v1067_v40 }
 0x66c   :  { %1968 = vpow2.f32 %v1527_v28  ;;  %v1045_v19 = vadd.f32 1.0, %v1965_v33 }
 0x66d   :  { %1970 = vrcp.f32 %v1032_v31 }
 0x675   :  { %v1967_v57 = vpop.eup %1966 }
 0x676   :  { %v1969_v58 = vpop.eup %1968  ;;  %v1053_v37 = vmul.f32 %v1967_v57, %v1051_v36 }
 0x677   :  { %v1971_v42 = vpop.eup %1970  ;;  %v1046_v23 = vadd.f32 1.0, %v1969_v58 }
 0x678   :  { %v1055_v20 = vadd.f32 %v1053_v37, %v934_v30  ;;  %v1054_v21 = vmul.f32 %v1971_v42, %v1052_v41 }
 0x67a   :  { %1972 = vtanh.f32 %v1055_v20  ;;  %v1056_v22 = vadd.f32 %v1054_v21, %v937_v38 }
 0x67b   :  { %1974 = vrcp.f32 %v1045_v19 }
 0x67c   :  { %1976 = vtanh.f32 %v1056_v22 }
 0x67d   :  { %1978 = vrcp.f32 %v1046_v23 }
 0x684   :  { %v1973_v26 = vpop.eup %1972 }
 0x685   :  { %v1975_v34 = vpop.eup %1974  ;;  %v1059_v24 = vsub.f32 %v2535_v43, %v1973_v26  ;;  %v1068_v43 = vld [vmem:[#allocation3 + $0x9c] sm:$0xff] }
 0x686   :  { %v1977_v35 = vpop.eup %1976 }
 0x687   :  { %v1060_v2 = vsub.f32 %v2537_v44, %v1977_v35  ;;  %v1061_v56 = vmul.f32 %v1975_v34, %v1059_v24  ;;  %v1979_v52 = vpop.eup %1978  ;;  %v1852_v34 = vld [vmem:[#allocation8] sm:$0xff]   ;;  %v1853_v24 = vld [vmem:[#allocation8 + $0x8] sm:$0xff]  }
 0x689   :  { %v1062_v53 = vmul.f32 %v1979_v52, %v1060_v2  ;;  %v2626_v55 = vadd.f32 %v1973_v26, %v1061_v56  ;;  %v1855_v2 = vld [vmem:[#allocation8 + $0x18] sm:$0xff]   ;;  %v1856_v56 = vld [vmem:[#allocation8 + $0x20] sm:$0xff]   ;;  %v1857_v52 = vld [vmem:[#allocation8 + $0x28] sm:$0xff]  }
 0x68b   :  { %v2628_v59 = vadd.f32 %v1977_v35, %v1062_v53  ;;  %v1854_v35 = vld [vmem:[#allocation8 + $0x10] sm:$0xff]  }
 0x68c   :  { %v1858_v53 = vld [vmem:[#allocation8 + $0x30] sm:$0xff]  }
 0x68d   :  { %v1076_v39 = vpack.c.bf16 %v2628_v59, %v2626_v55 }
 0x68f   :  { %1110 = vmatmul.mubr.bf16.vlgmr.msra.gmra.mrb[24].mxu0 %v1076_v39  ;;  %1763 = vmatmul.mubr.bf16.vlgmr.msra.gmra.mrb[24].mxu1 %v1076_v39  ;;  %v1206_v39 = vld [vmem:[#allocation3 + $0xb4] sm:$0xff] }
 0x690   :  { %1216 = vmatpush1.bf16.msra.mxu0 %v2541_v45  ;;  %1767 = vmatpush3.bf16.msra.mxu1 %v2544_v46  ;;  %v1073_v45 = vunpack.c.l.bf16 %v1068_v43 }
 0x691   :  { %1217 = vmatprep.subr.bf16.mxu0 %v2547_v49  ;;  %1768 = vmatprep.subr.bf16.mxu1 %v2146_v0 }
 0x692   :  { %1247 = vmatprep.mubr.bf16.mxu0 %v2147_v1  ;;  %1782 = vmatprep.mubr.msk.bf16.mxu1 %vm2148_vm0, %v2146_v0  ;;  %v1066_v1 = vld [vmem:[#allocation3 + $0x90] sm:$0xff] }
 0x693   :  { %v1070_v44 = vunpack.c.l.bf16 %v1066_v1 }
 0x694   :  { %1218 = vmatpush1.bf16.msra.mxu0 %v2554_v50  ;;  %1769 = vmatpush3.bf16.msra.mxu1 %v2557_v48 }
 0x695   :  { %1219 = vmatprep.subr.bf16.mxu0 %v2560_v47  ;;  %1770 = vmatprep.subr.bf16.mxu1 %v2146_v0 }
 0x698   :  { %1220 = vmatpush1.bf16.msra.mxu0 %v2564_v51  ;;  %1771 = vmatpush3.bf16.msra.mxu1 %v2567_v54 }
 0x699   :  { %1221 = vmatprep.subr.bf16.mxu0 %v2570_v4  ;;  %1772 = vmatprep.subr.bf16.mxu1 %v2146_v0 }
 0x69c   :  { %1222 = vmatpush1.bf16.msra.mxu0 %v2574_v5  ;;  %1773 = vmatpush3.bf16.msra.mxu1 %v2577_v6 }
 0x69d   :  { %1223 = vmatprep.subr.bf16.mxu0 %v2580_v7  ;;  %1774 = vmatprep.subr.bf16.mxu1 %v2146_v0 }
 0x6a0   :  { %1224 = vmatpush1.bf16.msra.mxu0 %v2584_v8  ;;  %1775 = vmatpush3.bf16.msra.mxu1 %v2587_v9  ;;  %v1071_v8 = vunpack.c.h.bf16 %v1066_v1 }
 0x6a1   :  { %1225 = vmatprep.subr.bf16.mxu0 %v2590_v10  ;;  %1776 = vmatprep.subr.bf16.mxu1 %v2146_v0  ;;  %v1074_v10 = vunpack.c.h.bf16 %v1068_v43  ;;  %v1211_v43 = vunpack.c.l.bf16 %v1206_v39 }
 0x6a4   :  { %1226 = vmatpush1.bf16.msra.mxu0 %v2594_v11  ;;  %1777 = vmatpush3.bf16.msra.mxu1 %v2597_v12 }
 0x6a5   :  { %1227 = vmatprep.subr.bf16.mxu0 %v2600_v13  ;;  %1778 = vmatprep.subr.bf16.mxu1 %v2146_v0 }
 0x6a8   :  { %1228 = vmatpush1.bf16.msra.mxu0 %v2604_v14  ;;  %1779 = vmatpush3.bf16.msra.mxu1 %v2607_v15 }
 0x6a9   :  { %1229 = vmatprep.subr.bf16.mxu0 %v2610_v16  ;;  %1780 = vmatprep.subr.bf16.mxu1 %v2146_v0 }
 0x6ac   :  { %1230 = vmatpush1.bf16.msra.mxu0 %v2614_v17  ;;  %1781 = vmatpush3.bf16.msra.mxu1 %v2617_v18 }
 0x6ad   :  { %1786 = vmatprep.subr.bf16.mxu0 %v2146_v0 }
 0x762   :  { %v1111_v46 = vpop.f32.mrb[24].mxu0  ;;  %v1154_v49 = vpop.f32.mrb[24].mxu1 }
 0x763   :  { %v1161_v50 = vadd.f32 %v1111_v46, %v1070_v44  ;;  %v1113_v48 = vpop.f32.mrb[25].mxu0  ;;  %v1764_v47 = vpop.f32.mrb[25].mxu1  ;;  %v1189_v62 = vadd.f32 %v2669_v61, %v1154_v49 }
 0x764   :  { %v1115_v51 = vpop.f32.mrb[26].mxu0  ;;  %v1157_v54 = vpop.f32.mrb[26].mxu1  ;;  %v1175_v11 = vadd.f32 %v1113_v48, %v1071_v8 }
 0x765   :  { %v1528_v4 = vmul.f32 -1.442695, %v1161_v50  ;;  %v1162_v5 = vadd.f32 %v1115_v51, %v1073_v45  ;;  %v1117_v6 = vpop.f32.mrb[27].mxu0  ;;  %v1765_v7 = vpop.f32.mrb[27].mxu1  ;;  %v1190_v29 = vadd.f32 %v2669_v61, %v1157_v54 }
 0x766   :  { %v1176_v12 = vadd.f32 %v1117_v6, %v1074_v10  ;;  %v1530_v13 = vmul.f32 -1.442695, %v1175_v11 }
 0x767   :  { %1980 = vpow2.f32 %v1528_v4  ;;  %v1529_v9 = vmul.f32 -1.442695, %v1162_v5 }
 0x768   :  { %v1531_v15 = vmul.f32 -1.442695, %v1176_v12 }
 0x769   :  { %1982 = vpow2.f32 %v1529_v9 }
 0x76a   :  { %1984 = vpow2.f32 %v1530_v13 }
 0x771   :  { %v1981_v14 = vpop.eup %1980 }
 0x772   :  { %v1169_v16 = vadd.f32 1.0, %v1981_v14 }
 0x773   :  { %v1983_v17 = vpop.eup %1982 }
 0x774   :  { %1986 = vrcp.f32 %v1169_v16  ;;  %v1170_v18 = vadd.f32 1.0, %v1983_v17  ;;  %v1985_v3 = vpop.eup %1984  ;;  %v1205_v16 = vld [vmem:[#allocation3 + $0xb0] ss:$12 sps:$4 sm:$0xff]  }
 0x775   :  { %1988 = vpow2.f32 %v1531_v15  ;;  %v1183_v32 = vadd.f32 1.0, %v1985_v3 }
 0x776   :  { %1990 = vrcp.f32 %v1170_v18  ;;  %v1210_v18 = vunpack.c.l.bf16 %v1205_v16 }
 0x77e   :  { %v1987_v25 = vpop.eup %1986 }
 0x77f   :  { %v1989_v27 = vpop.eup %1988  ;;  %v1191_v28 = vmul.f32 %v1987_v25, %v1189_v62  ;;  %v1213_v25 = vunpack.c.h.bf16 %v1205_v16 }
 0x780   :  { %v1991_v31 = vpop.eup %1990  ;;  %v1184_v57 = vadd.f32 1.0, %v1989_v27 }
 0x781   :  { %v1193_v33 = vadd.f32 %v1191_v28, %v1072_v60  ;;  %v1192_v30 = vmul.f32 %v1991_v31, %v1190_v29 }
 0x783   :  { %1992 = vtanh.f32 %v1193_v33  ;;  %v1194_v36 = vadd.f32 %v1192_v30, %v1075_v63 }
 0x784   :  { %1994 = vrcp.f32 %v1183_v32 }
 0x785   :  { %1996 = vtanh.f32 %v1194_v36 }
 0x786   :  { %1998 = vrcp.f32 %v1184_v57 }
 0x78d   :  { %v1993_v58 = vpop.eup %1992 }
 0x78e   :  { %v1995_v37 = vpop.eup %1994  ;;  %v1197_v38 = vsub.f32 %v2626_v55, %v1993_v58  ;;  %v1859_v55 = vld [vmem:[#allocation8 + $0x38] sm:$0xff]  }
 0x78f   :  { %v1997_v41 = vpop.eup %1996 }
 0x790   :  { %v1198_v42 = vsub.f32 %v2628_v59, %v1997_v41  ;;  %v1199_v19 = vmul.f32 %v1995_v37, %v1197_v38  ;;  %v1999_v20 = vpop.eup %1998  ;;  %v1204_v59 = vld [vmem:[#allocation3 + $0xa8] sm:$0xff] }
 0x791   :  { %v1208_v1 = vunpack.c.l.bf16 %v1204_v59  ;;  %v1209_v6 = vunpack.c.h.bf16 %v1204_v59 }
 0x792   :  { %v1200_v21 = vmul.f32 %v1999_v20, %v1198_v42  ;;  %v2675_v22 = vadd.f32 %v1993_v58, %v1199_v19 }
 0x794   :  { %v2677_v23 = vadd.f32 %v1997_v41, %v1200_v21  ;;  %v1536_v21 = vld [vmem:[%s2713_s4] ss:$0 sm:$0xff] }
 0x796   :  { %v1214_v26 = vpack.c.bf16 %v2677_v23, %v2675_v22 }
 0x798   :  { %1248 = vmatmul.mubr.bf16.vlgmr.msra.gmra.mrb[28].mxu0 %v1214_v26  ;;  %1783 = vmatmul.mubr.bf16.vlgmr.msra.gmra.mrb[28].mxu1 %v1214_v26 }
 0x799   :  { %1802 = vmatprep.mubr.msk.bf16.mxu0 %vm2148_vm0, %v2146_v0  ;;  %1787 = vmatpush3.bf16.msra.mxu0 %v1852_v34 }
 0x79a   :  { %1788 = vmatprep.subr.bf16.mxu0 %v2146_v0 }
 0x79d   :  { %1789 = vmatpush3.bf16.msra.mxu0 %v1853_v24 }
 0x79e   :  { %1790 = vmatprep.subr.bf16.mxu0 %v2146_v0 }
 0x7a1   :  { %1791 = vmatpush3.bf16.msra.mxu0 %v1854_v35 }
 0x7a2   :  { %1792 = vmatprep.subr.bf16.mxu0 %v2146_v0 }
 0x7a5   :  { %1793 = vmatpush3.bf16.msra.mxu0 %v1855_v2 }
 0x7a6   :  { %1794 = vmatprep.subr.bf16.mxu0 %v2146_v0 }
 0x7a9   :  { %1795 = vmatpush3.bf16.msra.mxu0 %v1856_v56 }
 0x7aa   :  { %1796 = vmatprep.subr.bf16.mxu0 %v2146_v0 }
 0x7ad   :  { %1797 = vmatpush3.bf16.msra.mxu0 %v1857_v52 }
 0x7ae   :  { %1798 = vmatprep.subr.bf16.mxu0 %v2146_v0 }
 0x7b1   :  { %1799 = vmatpush3.bf16.msra.mxu0 %v1858_v53 }
 0x7b2   :  { %1800 = vmatprep.subr.bf16.mxu0 %v2146_v0  ;;  %v1212_v0 = vunpack.c.h.bf16 %v1206_v39 }
 0x7b5   :  { %1801 = vmatpush3.bf16.msra.mxu0 %v1859_v55 }
 0x86b   :  { %v1249_v44 = vpop.f32.mrb[28].mxu0  ;;  %v1292_v45 = vpop.f32.mrb[28].mxu1 }
 0x86c   :  { %v1299_v46 = vadd.f32 %v1249_v44, %v1208_v1  ;;  %v1251_v49 = vpop.f32.mrb[29].mxu0  ;;  %v1784_v50 = vpop.f32.mrb[29].mxu1  ;;  %v1327_v40 = vadd.f32 %v2669_v61, %v1292_v45 }
 0x86d   :  { %v1253_v48 = vpop.f32.mrb[30].mxu0  ;;  %v1295_v47 = vpop.f32.mrb[30].mxu1  ;;  %v1313_v8 = vadd.f32 %v1251_v49, %v1209_v6 }
 0x86e   :  { %v1532_v51 = vmul.f32 -1.442695, %v1299_v46  ;;  %v1300_v54 = vadd.f32 %v1253_v48, %v1211_v43  ;;  %v1255_v4 = vpop.f32.mrb[31].mxu0  ;;  %v1785_v5 = vpop.f32.mrb[31].mxu1  ;;  %v1328_v27 = vadd.f32 %v2669_v61, %v1295_v47 }
 0x86f   :  { %v1314_v9 = vadd.f32 %v1255_v4, %v1212_v0  ;;  %v1534_v10 = vmul.f32 -1.442695, %v1313_v8 }
 0x870   :  { %2000 = vpow2.f32 %v1532_v51  ;;  %v1533_v7 = vmul.f32 -1.442695, %v1300_v54 }
 0x871   :  { %v1535_v12 = vmul.f32 -1.442695, %v1314_v9 }
 0x872   :  { %2002 = vpow2.f32 %v1533_v7 }
 0x873   :  { %2004 = vpow2.f32 %v1534_v10 }
 0x87a   :  { %v2001_v11 = vpop.eup %2000 }
 0x87b   :  { %v1307_v13 = vadd.f32 1.0, %v2001_v11 }
 0x87c   :  { %v2003_v14 = vpop.eup %2002 }
 0x87d   :  { %2006 = vrcp.f32 %v1307_v13  ;;  %v1308_v15 = vadd.f32 1.0, %v2003_v14  ;;  %v2005_v17 = vpop.eup %2004 }
 0x87e   :  { %2008 = vpow2.f32 %v1535_v12  ;;  %v1321_v63 = vadd.f32 1.0, %v2005_v17 }
 0x87f   :  { %2010 = vrcp.f32 %v1308_v15 }
 0x887   :  { %v2007_v3 = vpop.eup %2006 }
 0x888   :  { %v2009_v60 = vpop.eup %2008  ;;  %v1329_v62 = vmul.f32 %v2007_v3, %v1327_v40 }
 0x889   :  { %v2011_v28 = vpop.eup %2010  ;;  %v1322_v33 = vadd.f32 1.0, %v2009_v60 }
 0x88a   :  { %v1331_v29 = vadd.f32 %v1329_v62, %v1210_v18  ;;  %v1330_v31 = vmul.f32 %v2011_v28, %v1328_v27 }
 0x88c   :  { %2012 = vtanh.f32 %v1331_v29  ;;  %v1332_v32 = vadd.f32 %v1330_v31, %v1213_v25 }
 0x88d   :  { %2014 = vrcp.f32 %v1321_v63 }
 0x88e   :  { %2016 = vtanh.f32 %v1332_v32 }
 0x88f   :  { %2018 = vrcp.f32 %v1322_v33 }
 0x896   :  { %v2013_v30 = vpop.eup %2012 }
 0x897   :  { %v2015_v36 = vpop.eup %2014  ;;  %v1335_v57 = vsub.f32 %v2675_v22, %v2013_v30 }
 0x898   :  { %v2017_v58 = vpop.eup %2016 }
 0x899   :  { %v1336_v37 = vsub.f32 %v2677_v23, %v2017_v58  ;;  %v1337_v38 = vmul.f32 %v2015_v36, %v1335_v57  ;;  %v2019_v41 = vpop.eup %2018 }
 0x89b   :  { %v1338_v61 = vmul.f32 %v2019_v41, %v1336_v37  ;;  %v1339_v42 = vadd.f32 %v2013_v30, %v1337_v38 }
 0x89d   :  { %v1340_v19 = vadd.f32 %v2017_v58, %v1338_v61 }
 0x89f   :  { %v1346_v20 = vpack.c.bf16 %v1340_v19, %v1339_v42 }
 0x8a1   :  { %1803 = vmatmul.mubr.bf16.vlgmr.msra.gmra.mrb[32].mxu0 %v1346_v20 }
 0x974   :  { %v1452_v26 = vpop.f32.mrb[32].mxu0 }
 0x975   :  { %v1453_v34 = vadd.f32 %v1536_v21, %v1452_v26  ;;  %v1804_v24 = vpop.f32.mrb[33].mxu0 }
 0x976   :  { %v1455_v22 = vpop.f32.mrb[34].mxu0 }
 0x977   :  { %1459 = vst [vmem:[#allocation9] sm:$0xff] %v1453_v34  ;;  %v1456_v23 = vadd.f32 %v1536_v21, %v1455_v22  ;;  %v1805_v35 = vpop.f32.mrb[35].mxu0 }
 0x979   :  { %1460 = vst [vmem:[#allocation9 + $0x8] sm:$0xff] %v1456_v23 }
 0x97a   :  { %2122 = shalt.err (!%p2119_p0)
}
 0x97b   :  { %s2123_s14 = scalar_lea.hbm %s2714_s5, 256 }
 0x97c   :  { %p2124_p1 = scmp.ne.s32.totalorder %s2714_s5, %s2123_s14  ;;  %p2127_p2 = scmp.lt.u32.totalorder %s2123_s14, %s2714_s5 }
 0x97e   :  { %p2129_p3 = pnand %p2127_p2, %p2124_p1 }
 0x980   :  { %2132 = shalt.err (!%p2129_p3)
}
 0x981   :  { %s2151_s18 = smov 128   ;;  %s2152_s19 = smov 8  }
 0x982   :  { %1472 = dma.vmem_to_hbm [thread:$0]  %s1467_s11, 256, %s2714_s5, [#allocation5], %s2151_s18, %s2151_s18, %s2152_s19  }
 0x983   :  { %2137 = dma.done.wait [#allocation5], 256  }
 0x984   :  { %2138 = vsyncadd [#allocation5], 4294967040 }
 0x985   :  { %1476 = vsyncpa [#allocation4], 1 }
 0x986   :  { %1477 = vsyncpa [#allocation7], 1 }
 0x987   :  { %1478 = vsyncpa [#allocation5], 1 }

</bundles_post_ra>
